<compile_context>
chip_gen: v6e
topology: v6e:2x2x1
jax: 0.10.0
libtpu: 0.0.40
codegen_flags: <defaults>
</compile_context>

<pallas_src>
import functools
import math

import jax
import jax.numpy as jnp
from jax.experimental import pallas as pl
from jax.experimental.pallas import tpu as pltpu

A_COEF = 0.7
B_COEF = 0.3
LN_EPS = 1e-5


# ---------------------------------------------------------------------------
# in-kernel math helpers
# ---------------------------------------------------------------------------
def _erf(z):
    # Abramowitz & Stegun 7.1.26 (max abs err ~1.5e-7). Built from exp + polynomial
    # only, so it lowers cleanly on the TPU VPU/EUP.
    # TODO(synk): switch to a native erf lowering if/when Mosaic grows one.
    a1, a2, a3, a4, a5 = (0.254829592, -0.284496736, 1.421413741,
                          -1.453152027, 1.061405429)
    p = 0.3275911
    s = jnp.where(z >= 0.0, 1.0, -1.0)
    az = jnp.abs(z)
    t = 1.0 / (1.0 + p * az)
    poly = t * (a1 + t * (a2 + t * (a3 + t * (a4 + t * a5))))
    return s * (1.0 - poly * jnp.exp(-az * az))


def _gelu_exact(z):
    # nn.GELU() default (erf-based, not the tanh approximation)
    return 0.5 * z * (1.0 + _erf(z * (1.0 / math.sqrt(2.0))))


def _layer_norm(z, gamma, beta):
    mu = jnp.mean(z, axis=-1, keepdims=True)
    var = jnp.mean((z - mu) ** 2, axis=-1, keepdims=True)
    return (z - mu) * jax.lax.rsqrt(var + LN_EPS) * gamma + beta


# ---------------------------------------------------------------------------
# kernel 1: LayerNorm + QKV projection + 0.7/0.3 mixing (all lane-dense)
# ---------------------------------------------------------------------------
def _mix_kernel(x_ref, qin_ref, kin_ref, vin_ref,
                ln_g_ref, ln_b_ref,
                wq_ref, bq_ref, wk_ref, bk_ref, wv_ref, bv_ref,
                qout_ref, kout_ref, vout_ref):
    cdt = wq_ref.dtype                                # bf16 (default) or f32
    x = x_ref[0]                                      # (TN, C) f32
    xn = _layer_norm(x, ln_g_ref[...], ln_b_ref[...])
    xn_c = xn.astype(cdt)

    qf = jnp.dot(xn_c, wq_ref[...], preferred_element_type=jnp.float32) + bq_ref[...]
    kf = jnp.dot(xn_c, wk_ref[...], preferred_element_type=jnp.float32) + bk_ref[...]
    vf = jnp.dot(xn_c, wv_ref[...], preferred_element_type=jnp.float32) + bv_ref[...]

    # Lane-dense stores (last dim = C = H*hd); head layout matches PyTorch's
    # view(B,N,H,hd) -> column h*hd + d.
    qout_ref[0] = A_COEF * qf + B_COEF * qin_ref[0]
    kout_ref[0] = A_COEF * kf + B_COEF * kin_ref[0]
    vout_ref[0] = B_COEF * vin_ref[0] + A_COEF * vf


# ---------------------------------------------------------------------------
# kernel 2: batched-heads attention + output projection + MLP
# ---------------------------------------------------------------------------
def _attn_mlp_kernel(q_ref, k_ref, v_ref, x_ref,
                     ln_g_ref, ln_b_ref,
                     wo_ref, bo_ref, w1_ref, b1_ref, w2_ref, b2_ref,
                     out_ref):
    cdt = wo_ref.dtype
    _, H, TQ, hd = q_ref.shape
    inv_sqrt_hd = 1.0 / math.sqrt(hd)

    gamma = ln_g_ref[...]
    beta = ln_b_ref[...]

    # ---- attention: all heads in one batched dot_general --------------------
    qh = (q_ref[0] * inv_sqrt_hd).astype(cdt)         # (H, TQ, hd): scale folded into Q
    kh = k_ref[0].astype(cdt)                         # (H, N,  hd)
    vh = v_ref[0].astype(cdt)                         # (H, N,  hd)

    s = jax.lax.dot_general(qh, kh, (((2,), (2,)), ((0,), (0,))),
                            preferred_element_type=jnp.float32)      # (H, TQ, N)
    m = jnp.max(s, axis=-1, keepdims=True)
    e = jnp.exp(s - m)
    denom = jnp.sum(e, axis=-1, keepdims=True)
    inv = pl.reciprocal(denom, approx=True)           # EUP slot
    inv = inv * (2.0 - denom * inv)                   # one Newton step -> ~f32 accuracy
    # TODO(synk): attn_dropout / MLP dropout are identity (eval mode).
    o = jax.lax.dot_general(e.astype(cdt), vh, (((2,), (1,)), ((0,), (0,))),
                            preferred_element_type=jnp.float32) * inv  # (H, TQ, hd)

    # ---- output projection: head-merge folded into the matmul ---------------
    # attn_flat @ Wo == sum_h o[h] @ Wo[h*hd:(h+1)*hd, :]   (no VMEM scratch,
    # no lane-dim concat/relayout; sublane slices of Wo are static).
    wo = wo_ref[...]                                  # (C, C)
    proj = bo_ref[...]                                # (1, C) -> broadcasts to (TQ, C)
    for h in range(H):                                # static, small H
        proj = proj + jnp.dot(o[h].astype(cdt), wo[h * hd:(h + 1) * hd, :],
                              preferred_element_type=jnp.float32)

    # ---- residual + LayerNorm + MLP + residual -------------------------------
    x1 = x_ref[0]                                     # (TQ, C) f32
    x2 = x1 + proj
    xn2 = _layer_norm(x2, gamma, beta)
    h1 = jnp.dot(xn2.astype(cdt), w1_ref[...],
                 preferred_element_type=jnp.float32) + b1_ref[...]
    hmid = _gelu_exact(h1)
    mlp = jnp.dot(hmid.astype(cdt), w2_ref[...],
                  preferred_element_type=jnp.float32) + b2_ref[...]
    out_ref[0] = mlp + x2                             # lane-dense (TQ, C) store


# ---------------------------------------------------------------------------
# spec / VMEM helpers
# ---------------------------------------------------------------------------
def _round_up(n, m):
    return ((n + m - 1) // m) * m


def _padded_bytes(shape, dtype):
    shape = tuple(int(d) for d in shape)
    if len(shape) == 0:
        elems = 1
    elif len(shape) == 1:
        elems = _round_up(shape[0], 128)
    else:
        elems = 1
        for d in shape[:-2]:
            elems *= d
        elems *= _round_up(shape[-2], 8) * _round_up(shape[-1], 128)
    return elems * jnp.dtype(dtype).itemsize


def _vmem_limit(entries):
    total = sum(_padded_bytes(s, d) * n for s, d, n in entries)
    total = int(total * 1.5) + (2 << 20)              # headroom + compiler scratch
    return max(16 << 20, min(total, 56 << 20))        # safe on v5e/v6e/v7x


def _choose_tile(n, target=512):
    """Largest token tile <= target that divides n (keeps the sublane dim aligned)."""
    if n <= target:
        return n
    t = (target // 8) * 8
    while t >= 8:
        if n % t == 0:
            return t
        t -= 8
    return n


def _resident_spec(arr):
    """Full-array block with a constant index map (weights / biases): the block
    index never changes, so Pallas only DMAs the array once."""
    nd = arr.ndim
    return pl.BlockSpec(arr.shape, lambda *_: (0,) * nd)


# ---------------------------------------------------------------------------
# forward pass
# ---------------------------------------------------------------------------
@jax.jit
def mfi_block_pallas(Query, Key, Value, x, p):
    """MFI_Block.forward -> (x_out, Query_mixed, Key_mixed, Value_mixed)."""
    B, N, C = x.shape
    H = Query.shape[1]
    hd = C // H
    hidden = p["w1"].shape[1]
    f32 = jnp.float32

    # (B,H,N,hd) <-> lane-dense (B,N,C) slabs (layout plumbing handled by XLA).
    def heads_to_flat(a):
        return jnp.transpose(a, (0, 2, 1, 3)).reshape(B, N, C)

    def flat_to_heads(a):
        return jnp.transpose(a.reshape(B, N, H, hd), (0, 2, 1, 3))

    q2d = heads_to_flat(Query)
    k2d = heads_to_flat(Key)
    v2d = heads_to_flat(Value)

    # ---------------------------------------------------------------- mixing
    TN = _choose_tile(N)
    nt = N // TN
    tile_spec = pl.BlockSpec((1, TN, C), lambda b, t: (b, t, 0))
    mix_weights = (p["ln_g"], p["ln_b"], p["wq"], p["bq"], p["wk"], p["bk"],
                   p["wv"], p["bv"])
    mix_in_specs = [tile_spec] * 4 + [_resident_spec(w) for w in mix_weights]
    mix_vmem = _vmem_limit(
        [((1, TN, C), f32, 2)] * 4
        + [(w.shape, w.dtype, 2) for w in mix_weights]
        + [((1, TN, C), f32, 2)] * 3)

    qmix2d, kmix2d, vmix2d = pl.pallas_call(
        _mix_kernel,
        out_shape=tuple(jax.ShapeDtypeStruct((B, N, C), f32) for _ in range(3)),
        grid_spec=pltpu.PrefetchScalarGridSpec(
            num_scalar_prefetch=0,
            grid=(B, nt),
            in_specs=mix_in_specs,
            out_specs=(tile_spec, tile_spec, tile_spec)),
        input_output_aliases={1: 0, 2: 1, 3: 2},     # reuse the q2d/k2d/v2d buffers
        compiler_params=pltpu.CompilerParams(
            dimension_semantics=("parallel", "parallel"),
            vmem_limit_bytes=mix_vmem),
    )(x, q2d, k2d, v2d, *mix_weights)

    Qmix = flat_to_heads(qmix2d)
    Kmix = flat_to_heads(kmix2d)
    Vmix = flat_to_heads(vmix2d)

    # ------------------------------------------------------- attention + MLP
    TQ = _choose_tile(N)
    nq = N // TQ
    q_spec = pl.BlockSpec((1, H, TQ, hd), lambda b, t: (b, 0, t, 0))
    kv_spec = pl.BlockSpec((1, H, N, hd), lambda b, t: (b, 0, 0, 0))
    xt_spec = pl.BlockSpec((1, TQ, C), lambda b, t: (b, t, 0))
    attn_weights = (p["ln_g"], p["ln_b"], p["wo"], p["bo"], p["w1"], p["b1"],
                    p["w2"], p["b2"])
    attn_in_specs = ([q_spec, kv_spec, kv_spec, xt_spec]
                     + [_resident_spec(w) for w in attn_weights])
    attn_vmem = _vmem_limit(
        [((1, H, TQ, hd), f32, 2), ((1, H, N, hd), f32, 2),
         ((1, H, N, hd), f32, 2), ((1, TQ, C), f32, 2),
         ((H, TQ, N), f32, 2), ((TQ, hidden), f32, 2)]   # in-kernel intermediates
        + [(w.shape, w.dtype, 2) for w in attn_weights]
        + [((1, TQ, C), f32, 2)])

    y = pl.pallas_call(
        _attn_mlp_kernel,
        out_shape=jax.ShapeDtypeStruct((B, N, C), f32),
        grid_spec=pltpu.PrefetchScalarGridSpec(
            num_scalar_prefetch=0,
            grid=(B, nq),
            in_specs=attn_in_specs,
            out_specs=xt_spec),
        compiler_params=pltpu.CompilerParams(
            dimension_semantics=("parallel", "parallel"),
            vmem_limit_bytes=attn_vmem),
    )(Qmix, Kmix, Vmix, x, *attn_weights)

    return y, Qmix, Kmix, Vmix


def prepare_params(params, compute_dtype=jnp.bfloat16):
    """One-time parameter staging: de-interleave the fused qk projection
    (even cols -> Q, odd cols -> K, exactly like .view(B,N,H,hd,2)) and cast the
    matmul weights to the compute dtype (bf16 by default for the MXU)."""
    f32 = jnp.float32
    cd = compute_dtype
    w_qk, b_qk = params["w_qk"], params["b_qk"]
    return {
        "ln_g": params["ln_g"].astype(f32).reshape(1, -1),
        "ln_b": params["ln_b"].astype(f32).reshape(1, -1),
        "wq": w_qk[:, 0::2].astype(cd),
        "wk": w_qk[:, 1::2].astype(cd),
        "bq": b_qk[0::2].astype(f32).reshape(1, -1),
        "bk": b_qk[1::2].astype(f32).reshape(1, -1),
        "wv": params["w_v"].astype(cd),
        "bv": params["b_v"].astype(f32).reshape(1, -1),
        "wo": params["w_o"].astype(cd),
        "bo": params["b_o"].astype(f32).reshape(1, -1),
        "w1": params["w1"].astype(cd),
        "b1": params["b1"].astype(f32).reshape(1, -1),
        "w2": params["w2"].astype(cd),
        "b2": params["b2"].astype(f32).reshape(1, -1),
    }


# ---------------------------------------------------------------------------
# Pure-JAX reference (mirrors the PyTorch forward, eval-mode dropout)
# ---------------------------------------------------------------------------
def mfi_block_ref(Query, Key, Value, x, params):
    B, N, C = x.shape
    H = Query.shape[1]
    hd = C // H

    def ln(z):
        mu = z.mean(-1, keepdims=True)
        var = ((z - mu) ** 2).mean(-1, keepdims=True)
        return (z - mu) / jnp.sqrt(var + LN_EPS) * params["ln_g"] + params["ln_b"]

    x1 = x
    xn = ln(x)
    qk = (xn @ params["w_qk"] + params["b_qk"]).reshape(B, N, H, hd, 2)
    qk = jnp.transpose(qk, (4, 0, 2, 1, 3))
    Qn, Kn = qk[0], qk[1]
    Qf = A_COEF * Qn + B_COEF * Query
    Kf = A_COEF * Kn + B_COEF * Key
    vnew = (xn @ params["w_v"] + params["b_v"]).reshape(B, N, H, hd).transpose(0, 2, 1, 3)
    Vf = B_COEF * Value + A_COEF * vnew

    attn = jnp.einsum("bhnd,bhmd->bhnm", Qf, Kf) / math.sqrt(hd)
    attn = jax.nn.softmax(attn, axis=-1)
    o = jnp.einsum("bhnm,bhmd->bhnd", attn, Vf).transpose(0, 2, 1, 3).reshape(B, N, C)
    o = o @ params["w_o"] + params["b_o"]
    x2 = x1 + o
    xn2 = ln(x2)
    hmid = jax.nn.gelu(xn2 @ params["w1"] + params["b1"], approximate=False)
    mlp = hmid @ params["w2"] + params["b2"]
    return mlp + x2, Qf, Kf, Vf


def init_params(key, C, hidden):
    ks = jax.random.split(key, 8)
    f32 = jnp.float32

    def lin_w(k, fi, fo):
        return (jax.random.normal(k, (fi, fo), f32) / math.sqrt(fi)).astype(f32)

    return {
        "ln_g": jnp.ones((C,), f32),
        "ln_b": jnp.zeros((C,), f32),
        "w_qk": lin_w(ks[0], C, 2 * C),
        "b_qk": 0.01 * jax.random.normal(ks[1], (2 * C,), f32),
        "w_v": lin_w(ks[2], C, C),
        "b_v": 0.01 * jax.random.normal(ks[3], (C,), f32),
        "w_o": lin_w(ks[4], C, C),
        "b_o": 0.01 * jax.random.normal(ks[5], (C,), f32),
        "w1": lin_w(ks[6], C, hidden),
        "b1": jnp.zeros((hidden,), f32),
        "w2": lin_w(ks[7], hidden, C),
        "b2": jnp.zeros((C,), f32),
    }


if __name__ == "__main__":
    B, N, C, H, HIDDEN = 2, 8, 32, 4, 64
    hd = C // H

    key = jax.random.PRNGKey(0)
    kq, kk, kv, kx, kp = jax.random.split(key, 5)
    Query = jax.random.normal(kq, (B, H, N, hd), jnp.float32)
    Key = jax.random.normal(kk, (B, H, N, hd), jnp.float32)
    Value = jax.random.normal(kv, (B, H, N, hd), jnp.float32)
    x = jax.random.normal(kx, (B, N, C), jnp.float32)
    params = init_params(kp, C, HIDDEN)

    refs = mfi_block_ref(Query, Key, Value, x, params)
    names = ("x_out", "Query", "Key", "Value")

    # 1) f32 compute path: tight semantic check against the pure-JAX reference.
    outs_f32 = jax.block_until_ready(
        mfi_block_pallas(Query, Key, Value, x, prepare_params(params, jnp.float32)))
    for name, a, b in zip(names, outs_f32, refs):
        if not jnp.allclose(a, b, atol=2e-3, rtol=2e-3):
            raise AssertionError(f"f32 mismatch in {name}: max abs err "
                                 f"{float(jnp.max(jnp.abs(a - b)))}")

    # 2) bf16 matmul path (performance default): looser tolerance.
    outs_bf16 = jax.block_until_ready(
        mfi_block_pallas(Query, Key, Value, x, prepare_params(params, jnp.bfloat16)))
    for name, a, b in zip(names, outs_bf16, refs):
        if not jnp.allclose(a, b, atol=1e-1, rtol=1e-1):
            raise AssertionError(f"bf16 mismatch in {name}: max abs err "
                                 f"{float(jnp.max(jnp.abs(a - b)))}")

    print("KERNEL_OK")
</pallas_src>

<mosaic_0001>
module attributes {stable_mosaic.version = 11 : i64} {
  func.func @_mix_kernel(%arg0: i32, %arg1: i32, %arg2: memref<1x8x32xf32, #tpu.memory_space<vmem>>, %arg3: memref<1x8x32xf32, #tpu.memory_space<vmem>>, %arg4: memref<1x8x32xf32, #tpu.memory_space<vmem>>, %arg5: memref<1x8x32xf32, #tpu.memory_space<vmem>>, %arg6: memref<1x32xf32, #tpu.memory_space<vmem>>, %arg7: memref<1x32xf32, #tpu.memory_space<vmem>>, %arg8: memref<32x32xf32, #tpu.memory_space<vmem>>, %arg9: memref<1x32xf32, #tpu.memory_space<vmem>>, %arg10: memref<32x32xf32, #tpu.memory_space<vmem>>, %arg11: memref<1x32xf32, #tpu.memory_space<vmem>>, %arg12: memref<32x32xf32, #tpu.memory_space<vmem>>, %arg13: memref<1x32xf32, #tpu.memory_space<vmem>>, %arg14: memref<1x8x32xf32, #tpu.memory_space<vmem>>, %arg15: memref<1x8x32xf32, #tpu.memory_space<vmem>>, %arg16: memref<1x8x32xf32, #tpu.memory_space<vmem>>) attributes {dimension_semantics = [#tpu.dimension_semantics<parallel>, #tpu.dimension_semantics<parallel>], iteration_bounds = array<i64: 2, 1>, scalar_prefetch = 0 : i64, scratch_operands = 0 : i64, tpu.core_type = #tpu.core_type<tc>, window_params = [{transform_indices = @transform_0, window_bounds = array<i64: 1, 8, 32>}, {transform_indices = @transform_1, window_bounds = array<i64: 1, 8, 32>}, {transform_indices = @transform_2, window_bounds = array<i64: 1, 8, 32>}, {transform_indices = @transform_3, window_bounds = array<i64: 1, 8, 32>}, {pipeline_mode = #tpu.pipeline_mode<synchronous>, transform_indices = @transform_4, window_bounds = array<i64: 1, 32>}, {pipeline_mode = #tpu.pipeline_mode<synchronous>, transform_indices = @transform_5, window_bounds = array<i64: 1, 32>}, {pipeline_mode = #tpu.pipeline_mode<synchronous>, transform_indices = @transform_6, window_bounds = array<i64: 32, 32>}, {pipeline_mode = #tpu.pipeline_mode<synchronous>, transform_indices = @transform_7, window_bounds = array<i64: 1, 32>}, {pipeline_mode = #tpu.pipeline_mode<synchronous>, transform_indices = @transform_8, window_bounds = array<i64: 32, 32>}, {pipeline_mode = #tpu.pipeline_mode<synchronous>, transform_indices = @transform_9, window_bounds = array<i64: 1, 32>}, {pipeline_mode = #tpu.pipeline_mode<synchronous>, transform_indices = @transform_10, window_bounds = array<i64: 32, 32>}, {pipeline_mode = #tpu.pipeline_mode<synchronous>, transform_indices = @transform_11, window_bounds = array<i64: 1, 32>}, {transform_indices = @transform_12, window_bounds = array<i64: 1, 8, 32>}, {transform_indices = @transform_13, window_bounds = array<i64: 1, 8, 32>}, {transform_indices = @transform_14, window_bounds = array<i64: 1, 8, 32>}]} {
    %c0 = arith.constant 0 : index
    %c0_0 = arith.constant 0 : index
    %c0_1 = arith.constant 0 : index
    %0 = vector.load %arg2[%c0, %c0_0, %c0_1] : memref<1x8x32xf32, #tpu.memory_space<vmem>>, vector<1x8x32xf32>
    %1 = vector.shape_cast %0 : vector<1x8x32xf32> to vector<8x32xf32>
    %c0_2 = arith.constant 0 : index
    %c0_3 = arith.constant 0 : index
    %2 = vector.load %arg6[%c0_2, %c0_3] : memref<1x32xf32, #tpu.memory_space<vmem>>, vector<1x32xf32>
    %c0_4 = arith.constant 0 : index
    %c0_5 = arith.constant 0 : index
    %3 = vector.load %arg7[%c0_4, %c0_5] : memref<1x32xf32, #tpu.memory_space<vmem>>, vector<1x32xf32>
    %cst = arith.constant dense<0.000000e+00> : vector<8xf32>
    %4 = vector.multi_reduction <add>, %1, %cst [1] : vector<8x32xf32> to vector<8xf32>
    %5 = vector.shape_cast %4 : vector<8xf32> to vector<8x1xf32>
    %cst_6 = arith.constant 3.200000e+01 : f32
    %6 = vector.broadcast %cst_6 : f32 to vector<8x1xf32>
    %7 = arith.divf %5, %6 : vector<8x1xf32>
    %8 = vector.broadcast %7 : vector<8x1xf32> to vector<8x32xf32>
    %9 = arith.subf %1, %8 : vector<8x32xf32>
    %10 = arith.mulf %9, %9 : vector<8x32xf32>
    %cst_7 = arith.constant dense<0.000000e+00> : vector<8xf32>
    %11 = vector.multi_reduction <add>, %10, %cst_7 [1] : vector<8x32xf32> to vector<8xf32>
    %12 = vector.shape_cast %11 : vector<8xf32> to vector<8x1xf32>
    %cst_8 = arith.constant 3.200000e+01 : f32
    %13 = vector.broadcast %cst_8 : f32 to vector<8x1xf32>
    %14 = arith.divf %12, %13 : vector<8x1xf32>
    %15 = vector.broadcast %7 : vector<8x1xf32> to vector<8x32xf32>
    %16 = arith.subf %1, %15 : vector<8x32xf32>
    %cst_9 = arith.constant 9.99999974E-6 : f32
    %17 = vector.broadcast %cst_9 : f32 to vector<8x1xf32>
    %18 = arith.addf %14, %17 : vector<8x1xf32>
    %19 = math.rsqrt %18 : vector<8x1xf32>
    %20 = vector.broadcast %19 : vector<8x1xf32> to vector<8x32xf32>
    %21 = arith.mulf %16, %20 : vector<8x32xf32>
    %22 = vector.broadcast %2 : vector<1x32xf32> to vector<8x32xf32>
    %23 = arith.mulf %21, %22 : vector<8x32xf32>
    %24 = vector.broadcast %3 : vector<1x32xf32> to vector<8x32xf32>
    %25 = arith.addf %23, %24 : vector<8x32xf32>
    %c0_10 = arith.constant 0 : index
    %c0_11 = arith.constant 0 : index
    %26 = vector.load %arg8[%c0_10, %c0_11] : memref<32x32xf32, #tpu.memory_space<vmem>>, vector<32x32xf32>
    %cst_12 = arith.constant dense<0.000000e+00> : vector<8x32xf32>
    %27 = tpu.matmul %25, %26, %cst_12 {dimension_numbers = #tpu.dot_dimension_numbers<[1], [0], [0], [1], [0, 0, 1, 1], [], []>} : vector<8x32xf32>, vector<32x32xf32>, vector<8x32xf32> -> vector<8x32xf32>
    %c0_13 = arith.constant 0 : index
    %c0_14 = arith.constant 0 : index
    %28 = vector.load %arg9[%c0_13, %c0_14] : memref<1x32xf32, #tpu.memory_space<vmem>>, vector<1x32xf32>
    %29 = vector.broadcast %28 : vector<1x32xf32> to vector<8x32xf32>
    %30 = arith.addf %27, %29 : vector<8x32xf32>
    %c0_15 = arith.constant 0 : index
    %c0_16 = arith.constant 0 : index
    %31 = vector.load %arg10[%c0_15, %c0_16] : memref<32x32xf32, #tpu.memory_space<vmem>>, vector<32x32xf32>
    %cst_17 = arith.constant dense<0.000000e+00> : vector<8x32xf32>
    %32 = tpu.matmul %25, %31, %cst_17 {dimension_numbers = #tpu.dot_dimension_numbers<[1], [0], [0], [1], [0, 0, 1, 1], [], []>} : vector<8x32xf32>, vector<32x32xf32>, vector<8x32xf32> -> vector<8x32xf32>
    %c0_18 = arith.constant 0 : index
    %c0_19 = arith.constant 0 : index
    %33 = vector.load %arg11[%c0_18, %c0_19] : memref<1x32xf32, #tpu.memory_space<vmem>>, vector<1x32xf32>
    %34 = vector.broadcast %33 : vector<1x32xf32> to vector<8x32xf32>
    %35 = arith.addf %32, %34 : vector<8x32xf32>
    %c0_20 = arith.constant 0 : index
    %c0_21 = arith.constant 0 : index
    %36 = vector.load %arg12[%c0_20, %c0_21] : memref<32x32xf32, #tpu.memory_space<vmem>>, vector<32x32xf32>
    %cst_22 = arith.constant dense<0.000000e+00> : vector<8x32xf32>
    %37 = tpu.matmul %25, %36, %cst_22 {dimension_numbers = #tpu.dot_dimension_numbers<[1], [0], [0], [1], [0, 0, 1, 1], [], []>} : vector<8x32xf32>, vector<32x32xf32>, vector<8x32xf32> -> vector<8x32xf32>
    %c0_23 = arith.constant 0 : index
    %c0_24 = arith.constant 0 : index
    %38 = vector.load %arg13[%c0_23, %c0_24] : memref<1x32xf32, #tpu.memory_space<vmem>>, vector<1x32xf32>
    %39 = vector.broadcast %38 : vector<1x32xf32> to vector<8x32xf32>
    %40 = arith.addf %37, %39 : vector<8x32xf32>
    %cst_25 = arith.constant 0.699999988 : f32
    %41 = vector.broadcast %cst_25 : f32 to vector<8x32xf32>
    %42 = arith.mulf %41, %30 : vector<8x32xf32>
    %c0_26 = arith.constant 0 : index
    %c0_27 = arith.constant 0 : index
    %c0_28 = arith.constant 0 : index
    %43 = vector.load %arg3[%c0_26, %c0_27, %c0_28] : memref<1x8x32xf32, #tpu.memory_space<vmem>>, vector<1x8x32xf32>
    %44 = vector.shape_cast %43 : vector<1x8x32xf32> to vector<8x32xf32>
    %cst_29 = arith.constant 3.000000e-01 : f32
    %45 = vector.broadcast %cst_29 : f32 to vector<8x32xf32>
    %46 = arith.mulf %45, %44 : vector<8x32xf32>
    %47 = arith.addf %42, %46 : vector<8x32xf32>
    %c0_30 = arith.constant 0 : index
    %c0_31 = arith.constant 0 : index
    %c0_32 = arith.constant 0 : index
    %48 = vector.load %arg14[%c0_30, %c0_31, %c0_32] : memref<1x8x32xf32, #tpu.memory_space<vmem>>, vector<1x8x32xf32>
    %49 = vector.shape_cast %48 : vector<1x8x32xf32> to vector<8x32xf32>
    %50 = vector.shape_cast %47 : vector<8x32xf32> to vector<1x8x32xf32>
    tpu.vector_store %arg14[%c0_30, %c0_31, %c0_32], %50 {strides = array<i32>} : memref<1x8x32xf32, #tpu.memory_space<vmem>>, vector<1x8x32xf32>,
    %cst_33 = arith.constant 0.699999988 : f32
    %51 = vector.broadcast %cst_33 : f32 to vector<8x32xf32>
    %52 = arith.mulf %51, %35 : vector<8x32xf32>
    %c0_34 = arith.constant 0 : index
    %c0_35 = arith.constant 0 : index
    %c0_36 = arith.constant 0 : index
    %53 = vector.load %arg4[%c0_34, %c0_35, %c0_36] : memref<1x8x32xf32, #tpu.memory_space<vmem>>, vector<1x8x32xf32>
    %54 = vector.shape_cast %53 : vector<1x8x32xf32> to vector<8x32xf32>
    %cst_37 = arith.constant 3.000000e-01 : f32
    %55 = vector.broadcast %cst_37 : f32 to vector<8x32xf32>
    %56 = arith.mulf %55, %54 : vector<8x32xf32>
    %57 = arith.addf %52, %56 : vector<8x32xf32>
    %c0_38 = arith.constant 0 : index
    %c0_39 = arith.constant 0 : index
    %c0_40 = arith.constant 0 : index
    %58 = vector.load %arg15[%c0_38, %c0_39, %c0_40] : memref<1x8x32xf32, #tpu.memory_space<vmem>>, vector<1x8x32xf32>
    %59 = vector.shape_cast %58 : vector<1x8x32xf32> to vector<8x32xf32>
    %60 = vector.shape_cast %57 : vector<8x32xf32> to vector<1x8x32xf32>
    tpu.vector_store %arg15[%c0_38, %c0_39, %c0_40], %60 {strides = array<i32>} : memref<1x8x32xf32, #tpu.memory_space<vmem>>, vector<1x8x32xf32>,
    %c0_41 = arith.constant 0 : index
    %c0_42 = arith.constant 0 : index
    %c0_43 = arith.constant 0 : index
    %61 = vector.load %arg5[%c0_41, %c0_42, %c0_43] : memref<1x8x32xf32, #tpu.memory_space<vmem>>, vector<1x8x32xf32>
    %62 = vector.shape_cast %61 : vector<1x8x32xf32> to vector<8x32xf32>
    %cst_44 = arith.constant 3.000000e-01 : f32
    %63 = vector.broadcast %cst_44 : f32 to vector<8x32xf32>
    %64 = arith.mulf %63, %62 : vector<8x32xf32>
    %cst_45 = arith.constant 0.699999988 : f32
    %65 = vector.broadcast %cst_45 : f32 to vector<8x32xf32>
    %66 = arith.mulf %65, %40 : vector<8x32xf32>
    %67 = arith.addf %64, %66 : vector<8x32xf32>
    %c0_46 = arith.constant 0 : index
    %c0_47 = arith.constant 0 : index
    %c0_48 = arith.constant 0 : index
    %68 = vector.load %arg16[%c0_46, %c0_47, %c0_48] : memref<1x8x32xf32, #tpu.memory_space<vmem>>, vector<1x8x32xf32>
    %69 = vector.shape_cast %68 : vector<1x8x32xf32> to vector<8x32xf32>
    %70 = vector.shape_cast %67 : vector<8x32xf32> to vector<1x8x32xf32>
    tpu.vector_store %arg16[%c0_46, %c0_47, %c0_48], %70 {strides = array<i32>} : memref<1x8x32xf32, #tpu.memory_space<vmem>>, vector<1x8x32xf32>,
    return
  }
  func.func @transform_0(%arg0: i32, %arg1: i32) -> (i32, i32, i32) {
    %c0_i32 = arith.constant 0 : i32
    %c0_i32_0 = arith.constant 0 : i32
    return %arg0, %arg1, %c0_i32 : i32, i32, i32
  }
  func.func @transform_1(%arg0: i32, %arg1: i32) -> (i32, i32, i32) {
    %c0_i32 = arith.constant 0 : i32
    %c0_i32_0 = arith.constant 0 : i32
    return %arg0, %arg1, %c0_i32 : i32, i32, i32
  }
  func.func @transform_2(%arg0: i32, %arg1: i32) -> (i32, i32, i32) {
    %c0_i32 = arith.constant 0 : i32
    %c0_i32_0 = arith.constant 0 : i32
    return %arg0, %arg1, %c0_i32 : i32, i32, i32
  }
  func.func @transform_3(%arg0: i32, %arg1: i32) -> (i32, i32, i32) {
    %c0_i32 = arith.constant 0 : i32
    %c0_i32_0 = arith.constant 0 : i32
    return %arg0, %arg1, %c0_i32 : i32, i32, i32
  }
  func.func @transform_4(%arg0: i32, %arg1: i32) -> (i32, i32) {
    %c0_i32 = arith.constant 0 : i32
    %c0_i32_0 = arith.constant 0 : i32
    %c0_i32_1 = arith.constant 0 : i32
    return %c0_i32, %c0_i32_0 : i32, i32
  }
  func.func @transform_5(%arg0: i32, %arg1: i32) -> (i32, i32) {
    %c0_i32 = arith.constant 0 : i32
    %c0_i32_0 = arith.constant 0 : i32
    %c0_i32_1 = arith.constant 0 : i32
    return %c0_i32, %c0_i32_0 : i32, i32
  }
  func.func @transform_6(%arg0: i32, %arg1: i32) -> (i32, i32) {
    %c0_i32 = arith.constant 0 : i32
    %c0_i32_0 = arith.constant 0 : i32
    %c0_i32_1 = arith.constant 0 : i32
    return %c0_i32, %c0_i32_0 : i32, i32
  }
  func.func @transform_7(%arg0: i32, %arg1: i32) -> (i32, i32) {
    %c0_i32 = arith.constant 0 : i32
    %c0_i32_0 = arith.constant 0 : i32
    %c0_i32_1 = arith.constant 0 : i32
    return %c0_i32, %c0_i32_0 : i32, i32
  }
  func.func @transform_8(%arg0: i32, %arg1: i32) -> (i32, i32) {
    %c0_i32 = arith.constant 0 : i32
    %c0_i32_0 = arith.constant 0 : i32
    %c0_i32_1 = arith.constant 0 : i32
    return %c0_i32, %c0_i32_0 : i32, i32
  }
  func.func @transform_9(%arg0: i32, %arg1: i32) -> (i32, i32) {
    %c0_i32 = arith.constant 0 : i32
    %c0_i32_0 = arith.constant 0 : i32
    %c0_i32_1 = arith.constant 0 : i32
    return %c0_i32, %c0_i32_0 : i32, i32
  }
  func.func @transform_10(%arg0: i32, %arg1: i32) -> (i32, i32) {
    %c0_i32 = arith.constant 0 : i32
    %c0_i32_0 = arith.constant 0 : i32
    %c0_i32_1 = arith.constant 0 : i32
    return %c0_i32, %c0_i32_0 : i32, i32
  }
  func.func @transform_11(%arg0: i32, %arg1: i32) -> (i32, i32) {
    %c0_i32 = arith.constant 0 : i32
    %c0_i32_0 = arith.constant 0 : i32
    %c0_i32_1 = arith.constant 0 : i32
    return %c0_i32, %c0_i32_0 : i32, i32
  }
  func.func @transform_12(%arg0: i32, %arg1: i32) -> (i32, i32, i32) {
    %c0_i32 = arith.constant 0 : i32
    %c0_i32_0 = arith.constant 0 : i32
    return %arg0, %arg1, %c0_i32 : i32, i32, i32
  }
  func.func @transform_13(%arg0: i32, %arg1: i32) -> (i32, i32, i32) {
    %c0_i32 = arith.constant 0 : i32
    %c0_i32_0 = arith.constant 0 : i32
    return %arg0, %arg1, %c0_i32 : i32, i32, i32
  }
  func.func @transform_14(%arg0: i32, %arg1: i32) -> (i32, i32, i32) {
    %c0_i32 = arith.constant 0 : i32
    %c0_i32_0 = arith.constant 0 : i32
    return %arg0, %arg1, %c0_i32 : i32, i32, i32
  }
}

module attributes {stable_mosaic.version = 11 : i64} {
  func.func @_attn_mlp_kernel(%arg0: i32, %arg1: i32, %arg2: memref<1x4x8x8xf32, #tpu.memory_space<vmem>>, %arg3: memref<1x4x8x8xf32, #tpu.memory_space<vmem>>, %arg4: memref<1x4x8x8xf32, #tpu.memory_space<vmem>>, %arg5: memref<1x8x32xf32, #tpu.memory_space<vmem>>, %arg6: memref<1x32xf32, #tpu.memory_space<vmem>>, %arg7: memref<1x32xf32, #tpu.memory_space<vmem>>, %arg8: memref<32x32xf32, #tpu.memory_space<vmem>>, %arg9: memref<1x32xf32, #tpu.memory_space<vmem>>, %arg10: memref<32x64xf32, #tpu.memory_space<vmem>>, %arg11: memref<1x64xf32, #tpu.memory_space<vmem>>, %arg12: memref<64x32xf32, #tpu.memory_space<vmem>>, %arg13: memref<1x32xf32, #tpu.memory_space<vmem>>, %arg14: memref<1x8x32xf32, #tpu.memory_space<vmem>>) attributes {dimension_semantics = [#tpu.dimension_semantics<parallel>, #tpu.dimension_semantics<parallel>], iteration_bounds = array<i64: 2, 1>, scalar_prefetch = 0 : i64, scratch_operands = 0 : i64, tpu.core_type = #tpu.core_type<tc>, window_params = [{transform_indices = @transform_0, window_bounds = array<i64: 1, 4, 8, 8>}, {transform_indices = @transform_1, window_bounds = array<i64: 1, 4, 8, 8>}, {transform_indices = @transform_2, window_bounds = array<i64: 1, 4, 8, 8>}, {transform_indices = @transform_3, window_bounds = array<i64: 1, 8, 32>}, {pipeline_mode = #tpu.pipeline_mode<synchronous>, transform_indices = @transform_4, window_bounds = array<i64: 1, 32>}, {pipeline_mode = #tpu.pipeline_mode<synchronous>, transform_indices = @transform_5, window_bounds = array<i64: 1, 32>}, {pipeline_mode = #tpu.pipeline_mode<synchronous>, transform_indices = @transform_6, window_bounds = array<i64: 32, 32>}, {pipeline_mode = #tpu.pipeline_mode<synchronous>, transform_indices = @transform_7, window_bounds = array<i64: 1, 32>}, {pipeline_mode = #tpu.pipeline_mode<synchronous>, transform_indices = @transform_8, window_bounds = array<i64: 32, 64>}, {pipeline_mode = #tpu.pipeline_mode<synchronous>, transform_indices = @transform_9, window_bounds = array<i64: 1, 64>}, {pipeline_mode = #tpu.pipeline_mode<synchronous>, transform_indices = @transform_10, window_bounds = array<i64: 64, 32>}, {pipeline_mode = #tpu.pipeline_mode<synchronous>, transform_indices = @transform_11, window_bounds = array<i64: 1, 32>}, {transform_indices = @transform_12, window_bounds = array<i64: 1, 8, 32>}]} {
    %c0 = arith.constant 0 : index
    %c0_0 = arith.constant 0 : index
    %0 = vector.load %arg6[%c0, %c0_0] : memref<1x32xf32, #tpu.memory_space<vmem>>, vector<1x32xf32>
    %c0_1 = arith.constant 0 : index
    %c0_2 = arith.constant 0 : index
    %1 = vector.load %arg7[%c0_1, %c0_2] : memref<1x32xf32, #tpu.memory_space<vmem>>, vector<1x32xf32>
    %c0_3 = arith.constant 0 : index
    %c0_4 = arith.constant 0 : index
    %c0_5 = arith.constant 0 : index
    %c0_6 = arith.constant 0 : index
    %2 = vector.load %arg2[%c0_3, %c0_4, %c0_5, %c0_6] : memref<1x4x8x8xf32, #tpu.memory_space<vmem>>, vector<1x4x8x8xf32>
    %3 = vector.shape_cast %2 : vector<1x4x8x8xf32> to vector<4x8x8xf32>
    %cst = arith.constant 0.353553385 : f32
    %4 = vector.broadcast %cst : f32 to vector<4x8x8xf32>
    %5 = arith.mulf %3, %4 : vector<4x8x8xf32>
    %c0_7 = arith.constant 0 : index
    %c0_8 = arith.constant 0 : index
    %c0_9 = arith.constant 0 : index
    %c0_10 = arith.constant 0 : index
    %6 = vector.load %arg3[%c0_7, %c0_8, %c0_9, %c0_10] : memref<1x4x8x8xf32, #tpu.memory_space<vmem>>, vector<1x4x8x8xf32>
    %7 = vector.shape_cast %6 : vector<1x4x8x8xf32> to vector<4x8x8xf32>
    %c0_11 = arith.constant 0 : index
    %c0_12 = arith.constant 0 : index
    %c0_13 = arith.constant 0 : index
    %c0_14 = arith.constant 0 : index
    %8 = vector.load %arg4[%c0_11, %c0_12, %c0_13, %c0_14] : memref<1x4x8x8xf32, #tpu.memory_space<vmem>>, vector<1x4x8x8xf32>
    %9 = vector.shape_cast %8 : vector<1x4x8x8xf32> to vector<4x8x8xf32>
    %cst_15 = arith.constant dense<0.000000e+00> : vector<4x8x8xf32>
    %10 = tpu.matmul %5, %7, %cst_15 {dimension_numbers = #tpu.dot_dimension_numbers<[2], [2], [1], [1], [0, 0, 0, 1, 1, 1], [0], [0]>} : vector<4x8x8xf32>, vector<4x8x8xf32>, vector<4x8x8xf32> -> vector<4x8x8xf32>
    %cst_16 = arith.constant dense<0xFF800000> : vector<4x8xf32>
    %11 = vector.multi_reduction <maximumf>, %10, %cst_16 [2] : vector<4x8x8xf32> to vector<4x8xf32>
    %12 = vector.shape_cast %11 : vector<4x8xf32> to vector<4x8x1xf32>
    %13 = vector.broadcast %12 : vector<4x8x1xf32> to vector<4x8x8xf32>
    %14 = arith.subf %10, %13 : vector<4x8x8xf32>
    %15 = math.exp %14 : vector<4x8x8xf32>
    %cst_17 = arith.constant dense<0.000000e+00> : vector<4x8xf32>
    %16 = vector.multi_reduction <add>, %15, %cst_17 [2] : vector<4x8x8xf32> to vector<4x8xf32>
    %17 = vector.shape_cast %16 : vector<4x8xf32> to vector<4x8x1xf32>
    %18 = tpu.reciprocal %17 {approx = true} : vector<4x8x1xf32> -> vector<4x8x1xf32>
    %19 = arith.mulf %17, %18 : vector<4x8x1xf32>
    %cst_18 = arith.constant 2.000000e+00 : f32
    %20 = vector.broadcast %cst_18 : f32 to vector<4x8x1xf32>
    %21 = arith.subf %20, %19 : vector<4x8x1xf32>
    %22 = arith.mulf %18, %21 : vector<4x8x1xf32>
    %cst_19 = arith.constant dense<0.000000e+00> : vector<4x8x8xf32>
    %23 = tpu.matmul %15, %9, %cst_19 {dimension_numbers = #tpu.dot_dimension_numbers<[2], [1], [1], [2], [0, 0, 0, 1, 1, 2], [0], [0]>} : vector<4x8x8xf32>, vector<4x8x8xf32>, vector<4x8x8xf32> -> vector<4x8x8xf32>
    %24 = vector.broadcast %22 : vector<4x8x1xf32> to vector<4x8x8xf32>
    %25 = arith.mulf %23, %24 : vector<4x8x8xf32>
    %c0_20 = arith.constant 0 : index
    %c0_21 = arith.constant 0 : index
    %26 = vector.load %arg8[%c0_20, %c0_21] : memref<32x32xf32, #tpu.memory_space<vmem>>, vector<32x32xf32>
    %c0_22 = arith.constant 0 : index
    %c0_23 = arith.constant 0 : index
    %27 = vector.load %arg9[%c0_22, %c0_23] : memref<1x32xf32, #tpu.memory_space<vmem>>, vector<1x32xf32>
    %28 = vector.extract_strided_slice %25 {offsets = [0, 0, 0], sizes = [1, 8, 8], strides = [1, 1, 1]} : vector<4x8x8xf32> to vector<1x8x8xf32>
    %29 = vector.shape_cast %28 : vector<1x8x8xf32> to vector<8x8xf32>
    %30 = vector.extract_strided_slice %26 {offsets = [0, 0], sizes = [8, 32], strides = [1, 1]} : vector<32x32xf32> to vector<8x32xf32>
    %cst_24 = arith.constant dense<0.000000e+00> : vector<8x32xf32>
    %31 = tpu.matmul %29, %30, %cst_24 {dimension_numbers = #tpu.dot_dimension_numbers<[1], [0], [0], [1], [0, 0, 1, 1], [], []>} : vector<8x8xf32>, vector<8x32xf32>, vector<8x32xf32> -> vector<8x32xf32>
    %32 = vector.broadcast %27 : vector<1x32xf32> to vector<8x32xf32>
    %33 = arith.addf %32, %31 : vector<8x32xf32>
    %34 = vector.extract_strided_slice %25 {offsets = [1, 0, 0], sizes = [1, 8, 8], strides = [1, 1, 1]} : vector<4x8x8xf32> to vector<1x8x8xf32>
    %35 = vector.shape_cast %34 : vector<1x8x8xf32> to vector<8x8xf32>
    %36 = vector.extract_strided_slice %26 {offsets = [8, 0], sizes = [8, 32], strides = [1, 1]} : vector<32x32xf32> to vector<8x32xf32>
    %cst_25 = arith.constant dense<0.000000e+00> : vector<8x32xf32>
    %37 = tpu.matmul %35, %36, %cst_25 {dimension_numbers = #tpu.dot_dimension_numbers<[1], [0], [0], [1], [0, 0, 1, 1], [], []>} : vector<8x8xf32>, vector<8x32xf32>, vector<8x32xf32> -> vector<8x32xf32>
    %38 = arith.addf %33, %37 : vector<8x32xf32>
    %39 = vector.extract_strided_slice %25 {offsets = [2, 0, 0], sizes = [1, 8, 8], strides = [1, 1, 1]} : vector<4x8x8xf32> to vector<1x8x8xf32>
    %40 = vector.shape_cast %39 : vector<1x8x8xf32> to vector<8x8xf32>
    %41 = vector.extract_strided_slice %26 {offsets = [16, 0], sizes = [8, 32], strides = [1, 1]} : vector<32x32xf32> to vector<8x32xf32>
    %cst_26 = arith.constant dense<0.000000e+00> : vector<8x32xf32>
    %42 = tpu.matmul %40, %41, %cst_26 {dimension_numbers = #tpu.dot_dimension_numbers<[1], [0], [0], [1], [0, 0, 1, 1], [], []>} : vector<8x8xf32>, vector<8x32xf32>, vector<8x32xf32> -> vector<8x32xf32>
    %43 = arith.addf %38, %42 : vector<8x32xf32>
    %44 = vector.extract_strided_slice %25 {offsets = [3, 0, 0], sizes = [1, 8, 8], strides = [1, 1, 1]} : vector<4x8x8xf32> to vector<1x8x8xf32>
    %45 = vector.shape_cast %44 : vector<1x8x8xf32> to vector<8x8xf32>
    %46 = vector.extract_strided_slice %26 {offsets = [24, 0], sizes = [8, 32], strides = [1, 1]} : vector<32x32xf32> to vector<8x32xf32>
    %cst_27 = arith.constant dense<0.000000e+00> : vector<8x32xf32>
    %47 = tpu.matmul %45, %46, %cst_27 {dimension_numbers = #tpu.dot_dimension_numbers<[1], [0], [0], [1], [0, 0, 1, 1], [], []>} : vector<8x8xf32>, vector<8x32xf32>, vector<8x32xf32> -> vector<8x32xf32>
    %48 = arith.addf %43, %47 : vector<8x32xf32>
    %c0_28 = arith.constant 0 : index
    %c0_29 = arith.constant 0 : index
    %c0_30 = arith.constant 0 : index
    %49 = vector.load %arg5[%c0_28, %c0_29, %c0_30] : memref<1x8x32xf32, #tpu.memory_space<vmem>>, vector<1x8x32xf32>
    %50 = vector.shape_cast %49 : vector<1x8x32xf32> to vector<8x32xf32>
    %51 = arith.addf %50, %48 : vector<8x32xf32>
    %cst_31 = arith.constant dense<0.000000e+00> : vector<8xf32>
    %52 = vector.multi_reduction <add>, %51, %cst_31 [1] : vector<8x32xf32> to vector<8xf32>
    %53 = vector.shape_cast %52 : vector<8xf32> to vector<8x1xf32>
    %cst_32 = arith.constant 3.200000e+01 : f32
    %54 = vector.broadcast %cst_32 : f32 to vector<8x1xf32>
    %55 = arith.divf %53, %54 : vector<8x1xf32>
    %56 = vector.broadcast %55 : vector<8x1xf32> to vector<8x32xf32>
    %57 = arith.subf %51, %56 : vector<8x32xf32>
    %58 = arith.mulf %57, %57 : vector<8x32xf32>
    %cst_33 = arith.constant dense<0.000000e+00> : vector<8xf32>
    %59 = vector.multi_reduction <add>, %58, %cst_33 [1] : vector<8x32xf32> to vector<8xf32>
    %60 = vector.shape_cast %59 : vector<8xf32> to vector<8x1xf32>
    %cst_34 = arith.constant 3.200000e+01 : f32
    %61 = vector.broadcast %cst_34 : f32 to vector<8x1xf32>
    %62 = arith.divf %60, %61 : vector<8x1xf32>
    %63 = vector.broadcast %55 : vector<8x1xf32> to vector<8x32xf32>
    %64 = arith.subf %51, %63 : vector<8x32xf32>
    %cst_35 = arith.constant 9.99999974E-6 : f32
    %65 = vector.broadcast %cst_35 : f32 to vector<8x1xf32>
    %66 = arith.addf %62, %65 : vector<8x1xf32>
    %67 = math.rsqrt %66 : vector<8x1xf32>
    %68 = vector.broadcast %67 : vector<8x1xf32> to vector<8x32xf32>
    %69 = arith.mulf %64, %68 : vector<8x32xf32>
    %70 = vector.broadcast %0 : vector<1x32xf32> to vector<8x32xf32>
    %71 = arith.mulf %69, %70 : vector<8x32xf32>
    %72 = vector.broadcast %1 : vector<1x32xf32> to vector<8x32xf32>
    %73 = arith.addf %71, %72 : vector<8x32xf32>
    %c0_36 = arith.constant 0 : index
    %c0_37 = arith.constant 0 : index
    %74 = vector.load %arg10[%c0_36, %c0_37] : memref<32x64xf32, #tpu.memory_space<vmem>>, vector<32x64xf32>
    %cst_38 = arith.constant dense<0.000000e+00> : vector<8x64xf32>
    %75 = tpu.matmul %73, %74, %cst_38 {dimension_numbers = #tpu.dot_dimension_numbers<[1], [0], [0], [1], [0, 0, 1, 1], [], []>} : vector<8x32xf32>, vector<32x64xf32>, vector<8x64xf32> -> vector<8x64xf32>
    %c0_39 = arith.constant 0 : index
    %c0_40 = arith.constant 0 : index
    %76 = vector.load %arg11[%c0_39, %c0_40] : memref<1x64xf32, #tpu.memory_space<vmem>>, vector<1x64xf32>
    %77 = vector.broadcast %76 : vector<1x64xf32> to vector<8x64xf32>
    %78 = arith.addf %75, %77 : vector<8x64xf32>
    %cst_41 = arith.constant 5.000000e-01 : f32
    %79 = vector.broadcast %cst_41 : f32 to vector<8x64xf32>
    %80 = arith.mulf %79, %78 : vector<8x64xf32>
    %cst_42 = arith.constant 0.707106769 : f32
    %81 = vector.broadcast %cst_42 : f32 to vector<8x64xf32>
    %82 = arith.mulf %78, %81 : vector<8x64xf32>
    %cst_43 = arith.constant 0.000000e+00 : f32
    %83 = vector.broadcast %cst_43 : f32 to vector<8x64xf32>
    %84 = arith.cmpf oge, %82, %83 : vector<8x64xf32>
    %cst_44 = arith.constant 1.000000e+00 : f32
    %cst_45 = arith.constant -1.000000e+00 : f32
    %85 = vector.broadcast %cst_44 : f32 to vector<8x64xf32>
    %86 = vector.broadcast %cst_45 : f32 to vector<8x64xf32>
    %87 = arith.select %84, %85, %86 : vector<8x64xi1>, vector<8x64xf32>
    %88 = math.absf %82 : vector<8x64xf32>
    %cst_46 = arith.constant 0.327591091 : f32
    %89 = vector.broadcast %cst_46 : f32 to vector<8x64xf32>
    %90 = arith.mulf %89, %88 : vector<8x64xf32>
    %cst_47 = arith.constant 1.000000e+00 : f32
    %91 = vector.broadcast %cst_47 : f32 to vector<8x64xf32>
    %92 = arith.addf %91, %90 : vector<8x64xf32>
    %cst_48 = arith.constant 1.000000e+00 : f32
    %93 = vector.broadcast %cst_48 : f32 to vector<8x64xf32>
    %94 = arith.divf %93, %92 : vector<8x64xf32>
    %cst_49 = arith.constant 1.06140542 : f32
    %95 = vector.broadcast %cst_49 : f32 to vector<8x64xf32>
    %96 = arith.mulf %94, %95 : vector<8x64xf32>
    %cst_50 = arith.constant -1.45315206 : f32
    %97 = vector.broadcast %cst_50 : f32 to vector<8x64xf32>
    %98 = arith.addf %97, %96 : vector<8x64xf32>
    %99 = arith.mulf %94, %98 : vector<8x64xf32>
    %cst_51 = arith.constant 1.42141378 : f32
    %100 = vector.broadcast %cst_51 : f32 to vector<8x64xf32>
    %101 = arith.addf %100, %99 : vector<8x64xf32>
    %102 = arith.mulf %94, %101 : vector<8x64xf32>
    %cst_52 = arith.constant -0.284496725 : f32
    %103 = vector.broadcast %cst_52 : f32 to vector<8x64xf32>
    %104 = arith.addf %103, %102 : vector<8x64xf32>
    %105 = arith.mulf %94, %104 : vector<8x64xf32>
    %cst_53 = arith.constant 0.254829586 : f32
    %106 = vector.broadcast %cst_53 : f32 to vector<8x64xf32>
    %107 = arith.addf %106, %105 : vector<8x64xf32>
    %108 = arith.mulf %94, %107 : vector<8x64xf32>
    %cst_54 = arith.constant 0.000000e+00 : f32
    %109 = vector.broadcast %cst_54 : f32 to vector<8x64xf32>
    %110 = arith.subf %109, %88 : vector<8x64xf32>
    %111 = arith.mulf %110, %88 : vector<8x64xf32>
    %112 = math.exp %111 : vector<8x64xf32>
    %113 = arith.mulf %108, %112 : vector<8x64xf32>
    %cst_55 = arith.constant 1.000000e+00 : f32
    %114 = vector.broadcast %cst_55 : f32 to vector<8x64xf32>
    %115 = arith.subf %114, %113 : vector<8x64xf32>
    %116 = arith.mulf %87, %115 : vector<8x64xf32>
    %cst_56 = arith.constant 1.000000e+00 : f32
    %117 = vector.broadcast %cst_56 : f32 to vector<8x64xf32>
    %118 = arith.addf %117, %116 : vector<8x64xf32>
    %119 = arith.mulf %80, %118 : vector<8x64xf32>
    %c0_57 = arith.constant 0 : index
    %c0_58 = arith.constant 0 : index
    %120 = vector.load %arg12[%c0_57, %c0_58] : memref<64x32xf32, #tpu.memory_space<vmem>>, vector<64x32xf32>
    %cst_59 = arith.constant dense<0.000000e+00> : vector<8x32xf32>
    %121 = tpu.matmul %119, %120, %cst_59 {dimension_numbers = #tpu.dot_dimension_numbers<[1], [0], [0], [1], [0, 0, 1, 1], [], []>} : vector<8x64xf32>, vector<64x32xf32>, vector<8x32xf32> -> vector<8x32xf32>
    %c0_60 = arith.constant 0 : index
    %c0_61 = arith.constant 0 : index
    %122 = vector.load %arg13[%c0_60, %c0_61] : memref<1x32xf32, #tpu.memory_space<vmem>>, vector<1x32xf32>
    %123 = vector.broadcast %122 : vector<1x32xf32> to vector<8x32xf32>
    %124 = arith.addf %121, %123 : vector<8x32xf32>
    %125 = arith.addf %124, %51 : vector<8x32xf32>
    %c0_62 = arith.constant 0 : index
    %c0_63 = arith.constant 0 : index
    %c0_64 = arith.constant 0 : index
    %126 = vector.load %arg14[%c0_62, %c0_63, %c0_64] : memref<1x8x32xf32, #tpu.memory_space<vmem>>, vector<1x8x32xf32>
    %127 = vector.shape_cast %126 : vector<1x8x32xf32> to vector<8x32xf32>
    %128 = vector.shape_cast %125 : vector<8x32xf32> to vector<1x8x32xf32>
    tpu.vector_store %arg14[%c0_62, %c0_63, %c0_64], %128 {strides = array<i32>} : memref<1x8x32xf32, #tpu.memory_space<vmem>>, vector<1x8x32xf32>,
    return
  }
  func.func @transform_0(%arg0: i32, %arg1: i32) -> (i32, i32, i32, i32) {
    %c0_i32 = arith.constant 0 : i32
    %c0_i32_0 = arith.constant 0 : i32
    %c0_i32_1 = arith.constant 0 : i32
    return %arg0, %c0_i32, %arg1, %c0_i32_0 : i32, i32, i32, i32
  }
  func.func @transform_1(%arg0: i32, %arg1: i32) -> (i32, i32, i32, i32) {
    %c0_i32 = arith.constant 0 : i32
    %c0_i32_0 = arith.constant 0 : i32
    %c0_i32_1 = arith.constant 0 : i32
    %c0_i32_2 = arith.constant 0 : i32
    return %arg0, %c0_i32, %c0_i32_0, %c0_i32_1 : i32, i32, i32, i32
  }
  func.func @transform_2(%arg0: i32, %arg1: i32) -> (i32, i32, i32, i32) {
    %c0_i32 = arith.constant 0 : i32
    %c0_i32_0 = arith.constant 0 : i32
    %c0_i32_1 = arith.constant 0 : i32
    %c0_i32_2 = arith.constant 0 : i32
    return %arg0, %c0_i32, %c0_i32_0, %c0_i32_1 : i32, i32, i32, i32
  }
  func.func @transform_3(%arg0: i32, %arg1: i32) -> (i32, i32, i32) {
    %c0_i32 = arith.constant 0 : i32
    %c0_i32_0 = arith.constant 0 : i32
    return %arg0, %arg1, %c0_i32 : i32, i32, i32
  }
  func.func @transform_4(%arg0: i32, %arg1: i32) -> (i32, i32) {
    %c0_i32 = arith.constant 0 : i32
    %c0_i32_0 = arith.constant 0 : i32
    %c0_i32_1 = arith.constant 0 : i32
    return %c0_i32, %c0_i32_0 : i32, i32
  }
  func.func @transform_5(%arg0: i32, %arg1: i32) -> (i32, i32) {
    %c0_i32 = arith.constant 0 : i32
    %c0_i32_0 = arith.constant 0 : i32
    %c0_i32_1 = arith.constant 0 : i32
    return %c0_i32, %c0_i32_0 : i32, i32
  }
  func.func @transform_6(%arg0: i32, %arg1: i32) -> (i32, i32) {
    %c0_i32 = arith.constant 0 : i32
    %c0_i32_0 = arith.constant 0 : i32
    %c0_i32_1 = arith.constant 0 : i32
    return %c0_i32, %c0_i32_0 : i32, i32
  }
  func.func @transform_7(%arg0: i32, %arg1: i32) -> (i32, i32) {
    %c0_i32 = arith.constant 0 : i32
    %c0_i32_0 = arith.constant 0 : i32
    %c0_i32_1 = arith.constant 0 : i32
    return %c0_i32, %c0_i32_0 : i32, i32
  }
  func.func @transform_8(%arg0: i32, %arg1: i32) -> (i32, i32) {
    %c0_i32 = arith.constant 0 : i32
    %c0_i32_0 = arith.constant 0 : i32
    %c0_i32_1 = arith.constant 0 : i32
    return %c0_i32, %c0_i32_0 : i32, i32
  }
  func.func @transform_9(%arg0: i32, %arg1: i32) -> (i32, i32) {
    %c0_i32 = arith.constant 0 : i32
    %c0_i32_0 = arith.constant 0 : i32
    %c0_i32_1 = arith.constant 0 : i32
    return %c0_i32, %c0_i32_0 : i32, i32
  }
  func.func @transform_10(%arg0: i32, %arg1: i32) -> (i32, i32) {
    %c0_i32 = arith.constant 0 : i32
    %c0_i32_0 = arith.constant 0 : i32
    %c0_i32_1 = arith.constant 0 : i32
    return %c0_i32, %c0_i32_0 : i32, i32
  }
  func.func @transform_11(%arg0: i32, %arg1: i32) -> (i32, i32) {
    %c0_i32 = arith.constant 0 : i32
    %c0_i32_0 = arith.constant 0 : i32
    %c0_i32_1 = arith.constant 0 : i32
    return %c0_i32, %c0_i32_0 : i32, i32
  }
  func.func @transform_12(%arg0: i32, %arg1: i32) -> (i32, i32, i32) {
    %c0_i32 = arith.constant 0 : i32
    %c0_i32_0 = arith.constant 0 : i32
    return %arg0, %arg1, %c0_i32 : i32, i32, i32
  }
}

</mosaic_0001>

<bundles_post_ra>
// kernel: mfi_block_pallas.2
= control target key start
LH: loop header
LB: loop body
LE: loop exit
PB: predicated region body
PF: predicated region fallthrough
CT: control target
= control target key end

     0   :  { %s1308_s29 = smov 0   ;;  %s1310_s30 = smov 0   ;;  %s1427_s0 = inlined_call_operand.vmem [shape: f32[2,8,32], index: 0, kind: input, shape index: {}]   ;;  %s1428_s1 = inlined_call_operand.vmem [shape: f32[2,8,32], index: 1, kind: input, shape index: {}, may-alias: {1,12}]   ;;  %s1429_s2 = inlined_call_operand.vmem [shape: f32[2,8,32], index: 2, kind: input, shape index: {}, may-alias: {2,13}]   ;;  %s1430_s3 = inlined_call_operand.vmem [shape: f32[2,8,32], index: 3, kind: input, shape index: {}, may-alias: {3,14}]   ;;  %s1431_s4 = inlined_call_operand.vmem [shape: f32[1,32], index: 4, kind: input, shape index: {}]   ;;  %s1432_s5 = inlined_call_operand.vmem [shape: f32[1,32], index: 5, kind: input, shape index: {}]   ;;  %s1433_s6 = inlined_call_operand.vmem [shape: f32[32,32], index: 6, kind: input, shape index: {}]   ;;  %s1434_s7 = inlined_call_operand.vmem [shape: f32[1,32], index: 7, kind: input, shape index: {}]   ;;  %s1435_s8 = inlined_call_operand.vmem [shape: f32[32,32], index: 8, kind: input, shape index: {}]   ;;  %s1436_s9 = inlined_call_operand.vmem [shape: f32[1,32], index: 9, kind: input, shape index: {}]   ;;  %s1437_s10 = inlined_call_operand.vmem [shape: f32[32,32], index: 10, kind: input, shape index: {}]   ;;  %s1438_s11 = inlined_call_operand.vmem [shape: f32[1,32], index: 11, kind: input, shape index: {}]   ;;  %s1439_s12 = inlined_call_operand.vmem [shape: f32[2,8,32], index: 12, kind: output, shape index: {0}, may-alias: {1,12}]   ;;  %s1440_s13 = inlined_call_operand.vmem [shape: f32[2,8,32], index: 13, kind: output, shape index: {1}, may-alias: {2,13}]   ;;  %s1441_s14 = inlined_call_operand.vmem [shape: f32[2,8,32], index: 14, kind: output, shape index: {2}, may-alias: {3,14}]  }
   0x1   :  { %s1312_s15 = smov 0  }
   0x2 LB: > { %s37_s16 = sadd.s32 1, %s1225_s30  ;;  %p1113_p0 = scmp.ge.s32.totalorder %s1229_s15, 1  ;;  %s1229_s15 = sphi %s1312_s15, %s25_s15   ;;  %s1225_s30 = sphi %s1310_s30, %s1443_s30   ;;  %s1221_s29 = sphi %s1308_s29, %s1442_s29  }
   0x3   : > { %p39_p1 = scmp.ge.s32.totalorder %s37_s16, 2  ;;  %p481_p2 = scmp.lt.s32.totalorder %s1229_s15, 3 }
   0x5   : > { %s1445_s16 = smov (%p39_p1, %s37_s16), 0  ;;  %p482_p3 = pnand %p1113_p0, %p481_p2 }
   0x6   : > { %p566_p4 = scmp.lt.s32.totalorder (!%p482_p3), %s1221_s29, 1 }
   0x7   : > { %485 = sbr.rel (%p482_p3) target bundleno = 532 (0x214), region = 68 }
   0xc   : > { %s1447_s29 = smov (!%p566_p4, %s1221_s29), 1  ;;  %vm618_vm0 = vcmask 261120   ;;  %v650_v7 = vld [vmem:[%s1433_s6 + $0x18] sm:$0xff]  ;;  %v1231_v9 = vmov 0.0   ;;  %v649_v10 = vld [vmem:[%s1433_s6 + $0x10] sm:$0xff]  ;;  %v648_v12 = vld [vmem:[%s1433_s6 + $0x8] sm:$0xff] }
   0xd   : > { %s1326_s17 = sshll.u32 %s1447_s29, 3  ;;  %v734_v8 = vld [vmem:[%s1435_s8 + $0x18] sm:$0xff]  ;;  %1146 = vmatprep.subr.mxu0 %v1231_v9  ;;  %1157 = vmatprep.subr.mxu1 %v1231_v9  ;;  %v733_v11 = vld [vmem:[%s1435_s8 + $0x10] sm:$0xff]  ;;  %v732_v13 = vld [vmem:[%s1435_s8 + $0x8] sm:$0xff]  ;;  %vm1232_vm1 = vmmov 0  }
   0xe   : > { %s572_s20 = scalar_lea.vmem %s1427_s0, %s1326_s17  ;;  %1147 = vmatpush3.msra.mxu0 %v650_v7  ;;  %1158 = vmatpush3.msra.mxu1 %v734_v8  ;;  %v647_v14 = vld [vmem:[%s1433_s6] sm:$0xff]  ;;  %v815_v25 = vld [vmem:[%s1437_s10 + $0x18] sm:$0xff]  ;;  %v814_v26 = vld [vmem:[%s1437_s10 + $0x10] sm:$0xff]  ;;  %s579_s27 = scalar_lea.vmem %s1428_s1, %s1326_s17 }
   0xf   : > { %v615_v0 = vld [vmem:[%s572_s20] sm:$0xff]  ;;  %1148 = vmatprep.subr.mxu0 %v1231_v9  ;;  %1159 = vmatprep.subr.mxu1 %v1231_v9  ;;  %v813_v27 = vld [vmem:[%s1437_s10 + $0x8] sm:$0xff]  ;;  %s586_s18 = scalar_lea.vmem %s1429_s2, %s1326_s17  ;;  %s593_s25 = scalar_lea.vmem %s1430_s3, %s1326_s17 }
  0x10   : > { %v619_v1 = vsel %vm618_vm0, %v615_v0, 0.0  ;;  %1149 = vmatpush3.msra.mxu0 %v649_v10  ;;  %1160 = vmatpush3.msra.mxu1 %v733_v11  ;;  %v731_v15 = vld [vmem:[%s1435_s8] sm:$0xff]  ;;  %s600_s28 = scalar_lea.vmem %s1439_s12, %s1326_s17  ;;  %s607_s19 = scalar_lea.vmem %s1440_s13, %s1326_s17 }
  0x11   : > { %620 = vadd.xlane.f32.xlu0 %v619_v1  ;;  %1150 = vmatprep.subr.mxu0 %v1231_v9  ;;  %v1121_v20 = vld [vmem:[%s1431_s4] ss:$0 sm:$0xff]  ;;  %s614_s24 = scalar_lea.vmem %s1441_s14, %s1326_s17 }
  0x12   : > { %1161 = vmatprep.subr.mxu1 %v1231_v9  ;;  %1151 = vmatpush3.msra.mxu0 %v648_v12  ;;  %v1122_v22 = vld [vmem:[%s1432_s5] ss:$0 sm:$0xff] }
  0x13   : > { %1162 = vmatpush3.msra.mxu1 %v732_v13  ;;  %1152 = vmatprep.subr.mxu0 %v1231_v9  ;;  %v812_v28 = vld [vmem:[%s1437_s10] sm:$0xff] }
  0x14   : > { %1163 = vmatprep.subr.mxu1 %v1231_v9  ;;  %1153 = vmatpush3.msra.mxu0 %v647_v14  ;;  %v1123_v29 = vld [vmem:[%s1434_s7] ss:$0 sm:$0xff] }
  0x15   : > { %1154 = vmatprep.mubr.msk.f32.mxu0 %vm1232_vm1, %v1231_v9  ;;  %1164 = vmatpush3.msra.mxu1 %v731_v15  ;;  %v894_v30 = vld [vmem:[%s579_s27] sm:$0xff] }
  0x16   : > { %1165 = vmatprep.mubr.msk.f32.mxu1 %vm1232_vm1, %v1231_v9  ;;  %1168 = vmatprep.subr.mxu0 %v1231_v9  ;;  %v1125_v31 = vld [vmem:[%s1436_s9] ss:$0 sm:$0xff]  ;;  %v895_v36 = vmul.f32 0.3, %v894_v30 }
  0x17   : > { %v899_v32 = vld [vmem:[%s586_s18] sm:$0xff] }
  0x18   : > { %v900_v38 = vmul.f32 0.3, %v899_v32  ;;  %v1127_v45 = vld [vmem:[%s1438_s11] ss:$0 sm:$0xff] }
  0x19   : > { %v903_v46 = vld [vmem:[%s593_s25] sm:$0xff] }
  0x1a   : > { %v904_v49 = vmul.f32 0.3, %v903_v46 }
  0x9a   : > { %v621_v2 = vpop.xlane.xlu0 %620 }
  0x9b   : > { %v623_v3 = vmul.f32 0.03125, %v621_v2 }
  0x9d   : > { %v624_v4 = vsub.f32 %v615_v0, %v623_v3 }
  0x9f   : > { %v625_v5 = vmul.f32 %v624_v4, %v624_v4 }
  0xa1   : > { %v626_v6 = vsel %vm618_vm0, %v625_v5, 0.0 }
  0xa2   : > { %627 = vadd.xlane.f32.xlu0 %v626_v6 }
 0x12b   : > { %v628_v16 = vpop.xlane.xlu0 %627 }
 0x12c   : > { %v629_v17 = vmul.f32 0.03125, %v628_v16 }
 0x12e   : > { %v630_v18 = vadd.f32 1e-05, %v629_v17 }
 0x130   : > { %1205 = vrsqrt.f32 %v630_v18 }
 0x13d   : > { %v1206_v19 = vpop.eup %1205 }
 0x13e   : > { %v632_v21 = vmul.f32 %v1206_v19, %v624_v4 }
 0x140   : > { %v639_v23 = vmul.f32 %v1121_v20, %v632_v21 }
 0x142   : > { %v646_v24 = vadd.f32 %v1122_v22, %v639_v23 }
 0x144   : > { %1155 = vmatmul.mubr.msk.f32.vlgmr.msra.gmra.mxu0 %vm618_vm0, %v646_v24  ;;  %1166 = vmatmul.mubr.msk.f32.vlgmr.msra.gmra.mxu1 %vm618_vm0, %v646_v24 }
 0x145   : > { %1169 = vmatpush3.msra.mxu0 %v815_v25  ;;  %1176 = vmatprep.mubr.msk.f32.mxu0 %vm1232_vm1, %v1231_v9 }
 0x146   : > { %1170 = vmatprep.subr.mxu0 %v1231_v9 }
 0x147   : > { %1171 = vmatpush3.msra.mxu0 %v814_v26 }
 0x148   : > { %1172 = vmatprep.subr.mxu0 %v1231_v9 }
 0x149   : > { %1173 = vmatpush3.msra.mxu0 %v813_v27 }
 0x14a   : > { %1174 = vmatprep.subr.mxu0 %v1231_v9 }
 0x14b   : > { %1175 = vmatpush3.msra.mxu0 %v812_v28 }
 0x14c   : > { %1177 = vmatmul.mubr.msk.f32.vlgmr.msra.gmra.mxu0 %vm618_vm0, %v646_v24 }
 0x204   : > { %v727_v33 = vpop.f32.mrf.mxu0  ;;  %v808_v34 = vpop.f32.mrf.mxu1 }
 0x205   : > { %v728_v35 = vadd.f32 %v1123_v29, %v727_v33  ;;  %v809_v37 = vadd.f32 %v1125_v31, %v808_v34 }
 0x206   : > { %v1156_v39 = vpop.f32.mrf.mxu0  ;;  %v1167_v40 = vpop.f32.mrf.mxu1 }
 0x207   : > { %v893_v41 = vmul.f32 0.7, %v728_v35  ;;  %v898_v42 = vmul.f32 0.7, %v809_v37 }
 0x209   : > { %v896_v43 = vadd.f32 %v895_v36, %v893_v41  ;;  %v901_v44 = vadd.f32 %v900_v38, %v898_v42 }
 0x20b   : > { %897 = vst.msk [vmem:[%s600_s28] sm:$0xff] %vm618_vm0, %v896_v43  ;;  %902 = vst.msk [vmem:[%s607_s19] sm:$0xff] %vm618_vm0, %v901_v44 }
 0x20c   : > { %v889_v47 = vpop.f32.mrf.mxu0 }
 0x20d   : > { %v890_v48 = vadd.f32 %v1127_v45, %v889_v47 }
 0x20e   : > { %v1178_v50 = vpop.f32.mrf.mxu0 }
 0x20f   : > { %v905_v51 = vmul.f32 0.7, %v890_v48 }
 0x211   : > { %v906_v52 = vadd.f32 %v905_v51, %v904_v49 }
 0x213   : > { %907 = vst.msk [vmem:[%s614_s24] sm:$0xff] %vm618_vm0, %v906_v52 }
 0x214 PF: > { %s25_s15 = sadd.s32 1, %s1229_s15   ;;  %s1442_s29 = smov %s1225_s30 }
 0x215   : > { %p22_p5 = scmp.ge.s32.totalorder %s25_s15, 4   ;;  %s1443_s30 = smov %s1445_s16 }
 0x217   :  { %24 = sbr.rel (!%p22_p5) target bundleno = 2 (0x2), region = 131 }

// kernel: mfi_block_pallas.3
= control target key start
LH: loop header
LB: loop body
LE: loop exit
PB: predicated region body
PF: predicated region fallthrough
CT: control target
= control target key end

     0   :  { %s2507_s0 = inlined_call_operand.vmem [shape: f32[2,4,8,8], index: 0, kind: input, shape index: {}]   ;;  %s2508_s1 = inlined_call_operand.vmem [shape: f32[2,4,8,8], index: 1, kind: input, shape index: {}]   ;;  %s2509_s2 = inlined_call_operand.vmem [shape: f32[2,4,8,8], index: 2, kind: input, shape index: {}]   ;;  %s2510_s3 = inlined_call_operand.vmem [shape: f32[2,8,32], index: 3, kind: input, shape index: {}]   ;;  %s2511_s4 = inlined_call_operand.vmem [shape: f32[1,32], index: 4, kind: input, shape index: {}]   ;;  %s2512_s5 = inlined_call_operand.vmem [shape: f32[1,32], index: 5, kind: input, shape index: {}]   ;;  %s2513_s6 = inlined_call_operand.vmem [shape: f32[32,32], index: 6, kind: input, shape index: {}]   ;;  %s2514_s7 = inlined_call_operand.vmem [shape: f32[1,32], index: 7, kind: input, shape index: {}]   ;;  %s2515_s8 = inlined_call_operand.vmem [shape: f32[32,64], index: 8, kind: input, shape index: {}]   ;;  %s2516_s9 = inlined_call_operand.vmem [shape: f32[1,64], index: 9, kind: input, shape index: {}]   ;;  %s2517_s10 = inlined_call_operand.vmem [shape: f32[64,32], index: 10, kind: input, shape index: {}]   ;;  %s2518_s11 = inlined_call_operand.vmem [shape: f32[1,32], index: 11, kind: input, shape index: {}]   ;;  %s2519_s12 = inlined_call_operand.hbm [shape: f32[2,8,32], index: 12, kind: output, shape index: {}]  }
   0x1   :  { %2520 = sst [smem:[#allocation5_spill]] %s2507_s0 }
   0x2   :  { %2521 = sst [smem:[#allocation6_spill]] %s2508_s1 }
   0x3   :  { %2522 = sst [smem:[#allocation7_spill]] %s2509_s2 }
   0x4   :  { %2523 = sst [smem:[#allocation8_spill]] %s2510_s3 }
   0x5   :  { %17 = vsyncpa [#allocation3], 0 }
   0x6   :  { %19 = vsyncpa [#allocation3 + $0x1], 0  ;;  %s2242_s21 = smov 0   ;;  %s2244_s22 = smov 0  }
   0x7   :  { %s2246_s23 = smov 0   ;;  %s2248_s24 = smov 0  }
   0x8   :  { %s2250_s25 = smov 0   ;;  %s2252_s26 = smov 0  }
   0x9 LB: > { %s1844_s27 = sadd.s32 4294967295, %s2171_s26   ;;  %s1845_s28 = sadd.s32 4294967294, %s2171_s26   ;;  %s2171_s26 = sphi %s2252_s26, %s25_s26   ;;  %s2167_s25 = sphi %s2250_s25, %s2534_s25   ;;  %s2163_s24 = sphi %s2248_s24, %s2533_s24   ;;  %s2159_s23 = sphi %s2246_s23, %s2532_s23   ;;  %s2155_s22 = sphi %s2244_s22, %s2531_s22   ;;  %s2151_s21 = sphi %s2242_s21, %s2530_s21  }
   0xa   : > { %s37_s29 = sadd.s32 1, %s2167_s25  ;;  %s322_s30 = sadd.s32 1, %s2159_s23 }
   0xb   : > { %p39_p0 = scmp.ge.s32.totalorder %s37_s29, 2  ;;  %p332_p1 = scmp.ne.s32.totalorder %s2159_s23, %s2155_s22 }
   0xc   : > { %p333_p2 = scmp.eq.s32.totalorder %s1844_s27, 1  ;;  %p338_p3 = scmp.ne.s32.totalorder %s2155_s22, %s2151_s21 }
   0xd   : > { %s2536_s29 = smov (%p39_p0, %s37_s29), 0  ;;  %p339_p5 = scmp.eq.s32.totalorder %s1845_s28, 1 }
   0xe   : > { %p2282_p4 = por %p333_p2, %p332_p1  ;;  %s317_s14 = ssub.s32 %s2167_s25, %s2536_s29 }
   0xf   : > { %p1848_p6 = scmp.ge.s32.totalorder %s2171_s26, 1  ;;  %p320_p7 = scmp.eq.s32.totalorder %s317_s14, 0 }
  0x10   : > { %p2289_p8 = por %p339_p5, %p338_p3  ;;  %p418_p9 = scmp.lt.s32.totalorder %s2171_s26, 3 }
  0x11   : > { %s2295_s16 = scalar_select %p320_p7, %s2159_s23, %s322_s30  }
  0x12   : > { %p419_p10 = pnand %p1848_p6, %p418_p9 }
  0x13   : > { %p480_p11 = scmp.lt.s32.totalorder (!%p419_p10), %s2163_s24, 1  ;;  %s2526_s0 = sld [smem:[#allocation5_spill]] (!%p419_p10) }
  0x14   : > { %422 = sbr.rel (%p419_p10) target bundleno = 1550 (0x60e), region = 68  ;;  %s2527_s1 = sld [smem:[#allocation6_spill]] (!%p419_p10) }
  0x15   : > { %s2528_s2 = sld [smem:[#allocation7_spill]] (!%p419_p10)  ;;  %s477_s20 = sand.u32 (!%p419_p10), 1, %s2155_s22  }
  0x16   : > { %s2529_s3 = sld [smem:[#allocation8_spill]] (!%p419_p10)  ;;  %s1881_s28 = sshll.u32 (!%p419_p10), %s2163_s24, 7 }
  0x19   : > { %v2173_v0 = vmov 0.0   ;;  %vm2174_vm0 = vmmov 0   ;;  %s2302_s17 = scalar_select %p480_p11, %s2163_s24, 1  ;;  %vm523_vm1 = vcmask 64512   ;;  %v1176_v49 = vld [vmem:[%s2513_s6] sm:$0xff]  ;;  %v1177_v50 = vld [vmem:[%s2513_s6 + $0x8] sm:$0xff] }
  0x1a   : > { %1925 = vmatprep.subr.mxu0 %v2173_v0  ;;  %1927 = vmatprep.mubr.msk.f32.mxu0 %vm2174_vm0, %v2173_v0  ;;  %vm1485_vm2 = vcmask 261120   ;;  %vm1640_vm4 = vcmask 523264   ;;  %s2176_s24 = smov [#allocation2]  }
  0x1b   : > { %1940 = vmatprep.subr.mxu1 %v2173_v0  ;;  %1942 = vmatprep.mubr.msk.f32.mxu1 %vm2174_vm0, %v2173_v0  ;;  %s2308_s18 = sshll.u32 %s2302_s17, 5 }
  0x1c   : > { %s487_s27 = scalar_lea.vmem %s2526_s0, %s2308_s18  ;;  %s492_s14 = scalar_lea.vmem %s2527_s1, %s2308_s18 }
  0x1d   : > { %v515_v1 = vld [vmem:[%s492_s14] sm:$0xff]  ;;  %v508_v4 = vld [vmem:[%s487_s27 + $0x8] sm:$0xff]  ;;  %v518_v6 = vld [vmem:[%s492_s14 + $0x18] sm:$0xff]  ;;  %s1729_s1 = scalar_lea.hbm %s2519_s12, %s1881_s28 }
  0x1e   : > { %v507_v2 = vld [vmem:[%s487_s27] sm:$0xff]  ;;  %1926 = vmatpush3.xpose.msk.msra.mxu0 %vm523_vm1, %v515_v1  ;;  %v516_v5 = vld [vmem:[%s492_s14 + $0x8] sm:$0xff]  ;;  %v510_v7 = vld [vmem:[%s487_s27 + $0x18] sm:$0xff]  ;;  %1941 = vmatpush3.xpose.msk.msra.mxu1 %vm523_vm1, %v518_v6  ;;  %v512_v9 = vmul.f32 0.35355338, %v508_v4 }
  0x1f   : > { %v511_v3 = vmul.f32 0.35355338, %v507_v2  ;;  %1930 = vmatprep.subr.mxu0 %v2173_v0  ;;  %v514_v8 = vmul.f32 0.35355338, %v510_v7  ;;  %1950 = vmatprep.subr.mxu1 %v2173_v0  ;;  %v509_v10 = vld [vmem:[%s487_s27 + $0x10] sm:$0xff]  ;;  %s497_s27 = scalar_lea.vmem %s2528_s2, %s2308_s18  ;;  %s1717_s2 = scalar_lea.sflag [#allocation3], %s477_s20 }
  0x20   : > { %v517_v11 = vld [vmem:[%s492_s14 + $0x10] sm:$0xff]  ;;  %v513_v12 = vmul.f32 0.35355338, %v509_v10  ;;  %v519_v25 = vld [vmem:[%s497_s27] sm:$0xff]  ;;  %v520_v26 = vld [vmem:[%s497_s27 + $0x8] sm:$0xff]  ;;  %s1856_s14 = sshll.u32 %s2302_s17, 3 }
  0x21   : > { %1928 = vmatmul.mubr.msk.f32.vlgmr.msra.gmra.mxu0 %vm523_vm1, %v511_v3  ;;  %1943 = vmatmul.mubr.msk.f32.vlgmr.msra.gmra.mxu1 %vm523_vm1, %v514_v8  ;;  %v521_v39 = vld [vmem:[%s497_s27 + $0x10] sm:$0xff]  ;;  %v522_v42 = vld [vmem:[%s497_s27 + $0x18] sm:$0xff]  ;;  %s504_s27 = scalar_lea.vmem %s2529_s3, %s1856_s14 }
  0x22   : > { %1931 = vmatpush3.xpose.msk.msra.mxu0 %vm523_vm1, %v516_v5  ;;  %1932 = vmatprep.mubr.msk.f32.mxu0 %vm2174_vm0, %v2173_v0  ;;  %v1178_v4 = vld [vmem:[%s2513_s6 + $0x10] sm:$0xff] }
  0x23   : > { %1935 = vmatprep.subr.mxu0 %v2173_v0  ;;  %1952 = vmatprep.mubr.msk.f32.mxu1 %vm2174_vm0, %v2173_v0 }
  0x24   : > { %1951 = vmatpush3.msra.mxu1 %v520_v26 }
  0x25   : > { %1933 = vmatmul.mubr.msk.f32.vlgmr.msra.gmra.mxu0 %vm523_vm1, %v512_v9  ;;  %1960 = vmatprep.subr.mxu1 %v2173_v0 }
  0x26   : > { %1936 = vmatpush3.xpose.msk.msra.mxu0 %vm523_vm1, %v517_v11  ;;  %1937 = vmatprep.mubr.msk.f32.mxu0 %vm2174_vm0, %v2173_v0  ;;  %v1179_v11 = vld [vmem:[%s2513_s6 + $0x18] sm:$0xff] }
  0x27   : > { %1945 = vmatprep.subr.mxu0 %v2173_v0 }
  0x29   : > { %1938 = vmatmul.mubr.msk.f32.vlgmr.msra.gmra.mxu0 %vm523_vm1, %v513_v12 }
  0x2a   : > { %1947 = vmatprep.mubr.msk.f32.mxu0 %vm2174_vm0, %v2173_v0  ;;  %1946 = vmatpush3.msra.mxu0 %v519_v25 }
  0x2b   : > { %1955 = vmatprep.subr.mxu0 %v2173_v0 }
  0xe1   : > { %v596_v13 = vpop.f32.mrf.mxu0  ;;  %v824_v16 = vpop.f32.mrf.mxu1 }
  0xe2   : > { %v828_v14 = vsel %vm523_vm1, %v596_v13, -inf  ;;  %v837_v24 = vsel %vm523_vm1, %v824_v16, -inf }
  0xe3   : > { %829 = vmax.xlane.f32.xlu0 %v828_v14  ;;  %v1929_v15 = vpop.f32.mrf.mxu0  ;;  %v1944_v18 = vpop.f32.mrf.mxu1 }
  0xe5   : > { %v672_v17 = vpop.f32.mrf.mxu0 }
  0xe6   : > { %v831_v19 = vsel %vm523_vm1, %v672_v17, -inf }
  0xe7   : > { %832 = vmax.xlane.f32.xlu0 %v831_v19  ;;  %v1934_v20 = vpop.f32.mrf.mxu0 }
  0xe9   : > { %v748_v21 = vpop.f32.mrf.mxu0 }
  0xea   : > { %v834_v22 = vsel %vm523_vm1, %v748_v21, -inf }
  0xeb   : > { %835 = vmax.xlane.f32.xlu1 %v834_v22  ;;  %v1939_v23 = vpop.f32.mrf.mxu0 }
  0xef   : > { %838 = vmax.xlane.f32.xlu1 %v837_v24  ;;  %v1870_v24 = vld [vmem:[%s2514_s7] ss:$0 sm:$0xff] }
 0x16c   : > { %v830_v27 = vpop.xlane.xlu0 %829 }
 0x16d   : > { %v840_v28 = vsub.f32 %v596_v13, %v830_v27 }
 0x16f   : > { %v844_v29 = vmul.f32 1.442695, %v840_v28 }
 0x170   : > { %v833_v30 = vpop.xlane.xlu0 %832 }
 0x171   : > { %2073 = vpow2.f32 %v844_v29  ;;  %v841_v31 = vsub.f32 %v672_v17, %v833_v30 }
 0x173   : > { %v846_v32 = vmul.f32 1.442695, %v841_v31 }
 0x174   : > { %v836_v33 = vpop.xlane.xlu1 %835 }
 0x175   : > { %2075 = vpow2.f32 %v846_v32  ;;  %v842_v34 = vsub.f32 %v748_v21, %v836_v33  ;;  %v1483_v33 = vld [vmem:[%s504_s27] sm:$0xff]  ;;  %s1849_s27 = sshll.u32 %s477_s20, 3 }
 0x176   : > { %s479_s30 = scalar_lea.vmem [#allocation2], %s1849_s27  ;;  %s2099_s27 = sshll.u32 %s2176_s24, 4  ;;  %s2100_s27 = int_to_ptr.vmem [resolvable:$false] %s2099_s27 }
 0x177   : > { %v848_v35 = vmul.f32 1.442695, %v842_v34  ;;  %s1731_s14 = sshll.u32 %s479_s30, 4  ;;  %s2101_s17 = scalar_lea.vmem %s2100_s27, 256  ;;  %s1732_s14 = int_to_ptr.vmem [resolvable:$true] %s1731_s14 }
 0x178   : > { %v839_v36 = vpop.xlane.xlu1 %838  ;;  %s2095_s3 = scalar_lea.vmem %s1732_s14, 128  ;;  %p2102_p1 = scmp.lt.s32.totalorder %s1732_s14, %s2100_s27 }
 0x179   : > { %2077 = vpow2.f32 %v848_v35  ;;  %v843_v37 = vsub.f32 %v824_v16, %v839_v36  ;;  %p2096_p12 = scmp.ne.s32.totalorder %s1732_s14, %s2095_s3  ;;  %p2103_p2 = scmp.lt.s32.totalorder %s2101_s17, %s2095_s3 }
 0x17b   : > { %v850_v38 = vmul.f32 1.442695, %v843_v37  ;;  %p2097_p13 = pnand %p2096_p12, %p2282_p4  ;;  %p2104_p3 = por %p2103_p2, %p2102_p1 }
 0x17d   : > { %2079 = vpow2.f32 %v850_v38  ;;  %p2098_p0 = pneg %p2097_p13 }
 0x17e   : > { %v2074_v40 = vpop.eup %2073 }
 0x17f   : > { %1948 = vmatmul.mubr.msk.f32.vlgmr.msra.gmra.mxu0 %vm523_vm1, %v2074_v40  ;;  %v852_v41 = vsel %vm523_vm1, %v2074_v40, 0.0  ;;  %p2105_p5 = pnand %p2104_p3, %p2098_p0 }
 0x180   : > { %853 = vadd.xlane.f32.xlu0 %v852_v41  ;;  %1956 = vmatpush3.msra.mxu0 %v521_v39 }
 0x181   : > { %1957 = vmatprep.mubr.msk.f32.mxu0 %vm2174_vm0, %v2173_v0  ;;  %1965 = vmatprep.subr.mxu0 %v2173_v0 }
 0x182   : > { %v2076_v43 = vpop.eup %2075 }
 0x183   : > { %1953 = vmatmul.mubr.msk.f32.vlgmr.msra.gmra.mxu1 %vm523_vm1, %v2076_v43  ;;  %v855_v44 = vsel %vm523_vm1, %v2076_v43, 0.0  ;;  %v1517_v43 = vld [vmem:[%s2515_s8 + $0x18] sm:$0xff] }
 0x184   : > { %856 = vadd.xlane.f32.xlu1 %v855_v44  ;;  %1961 = vmatpush3.msra.mxu1 %v522_v42  ;;  %v1516_v44 = vld [vmem:[%s2515_s8 + $0x10] sm:$0xff] }
 0x185   : > { %1962 = vmatprep.mubr.msk.f32.mxu1 %vm2174_vm0, %v2173_v0  ;;  %1970 = vmatprep.subr.mxu1 %v2173_v0 }
 0x186   : > { %v2078_v45 = vpop.eup %2077 }
 0x187   : > { %1958 = vmatmul.mubr.msk.f32.vlgmr.msra.gmra.mxu0 %vm523_vm1, %v2078_v45  ;;  %v858_v46 = vsel %vm523_vm1, %v2078_v45, 0.0  ;;  %v1515_v45 = vld [vmem:[%s2515_s8 + $0x8] sm:$0xff] }
 0x188   : > { %859 = vadd.xlane.f32.xlu0 %v858_v46  ;;  %1967 = vmatprep.mubr.msk.f32.mxu0 %vm2174_vm0, %v2173_v0  ;;  %v1514_v46 = vld [vmem:[%s2515_s8] sm:$0xff] }
 0x189   : > { %1966 = vmatpush3.msra.mxu0 %v1176_v49 }
 0x18a   : > { %v2080_v47 = vpop.eup %2079  ;;  %1975 = vmatprep.subr.mxu0 %v2173_v0 }
 0x18b   : > { %1963 = vmatmul.mubr.msk.f32.vlgmr.msra.gmra.mxu1 %vm523_vm1, %v2080_v47  ;;  %v861_v48 = vsel %vm523_vm1, %v2080_v47, 0.0 }
 0x18c   : > { %862 = vadd.xlane.f32.xlu1 %v861_v48  ;;  %1972 = vmatprep.mubr.msk.f32.mxu1 %vm2174_vm0, %v2173_v0 }
 0x18d   : > { %1971 = vmatpush3.msra.mxu1 %v1177_v50 }
 0x18e   : > { %1980 = vmatprep.subr.mxu1 %v2173_v0 }
 0x209   : > { %v854_v51 = vpop.xlane.xlu0 %853 }
 0x20a   : > { %2081 = vrcp.f32 %v854_v51 }
 0x20d   : > { %v857_v52 = vpop.xlane.xlu1 %856 }
 0x20e   : > { %2083 = vrcp.f32 %v857_v52 }
 0x211   : > { %v860_v53 = vpop.xlane.xlu0 %859 }
 0x212   : > { %2085 = vrcp.f32 %v860_v53 }
 0x215   : > { %v863_v54 = vpop.xlane.xlu1 %862 }
 0x216   : > { %2087 = vrcp.f32 %v863_v54 }
 0x217   : > { %v2082_v55 = vpop.eup %2081 }
 0x218   : > { %v868_v56 = vmul.f32 %v2082_v55, %v854_v51  ;;  %v1874_v51 = vld [vmem:[%s2511_s4] ss:$0 sm:$0xff] }
 0x21a   : > { %v872_v58 = vsub.f32 2.0, %v868_v56  ;;  %v1632_v56 = vld [vmem:[%s2517_s10 + $0x38] sm:$0xff] }
 0x21b   : > { %v2084_v57 = vpop.eup %2083 }
 0x21c   : > { %v869_v59 = vmul.f32 %v2084_v57, %v857_v52  ;;  %v876_v63 = vmul.f32 %v2082_v55, %v872_v58  ;;  %v1630_v58 = vld [vmem:[%s2517_s10 + $0x28] sm:$0xff] }
 0x21e   : > { %v873_v61 = vsub.f32 2.0, %v869_v59  ;;  %v1629_v59 = vld [vmem:[%s2517_s10 + $0x20] sm:$0xff] }
 0x21f   : > { %v2086_v60 = vpop.eup %2085 }
 0x220   : > { %v870_v62 = vmul.f32 %v2086_v60, %v860_v53  ;;  %v877_v8 = vmul.f32 %v2084_v57, %v873_v61  ;;  %v1875_v53 = vld [vmem:[%s2512_s5] ss:$0 sm:$0xff]  ;;  %v1631_v57 = vld [vmem:[%s2517_s10 + $0x30] sm:$0xff] }
 0x221   : > { %v1627_v61 = vld [vmem:[%s2517_s10 + $0x10] sm:$0xff] }
 0x222   : > { %v874_v6 = vsub.f32 2.0, %v870_v62  ;;  %v1626_v62 = vld [vmem:[%s2517_s10 + $0x8] sm:$0xff] }
 0x223   : > { %v2088_v1 = vpop.eup %2087 }
 0x224   : > { %v871_v7 = vmul.f32 %v2088_v1, %v863_v54  ;;  %v878_v14 = vmul.f32 %v2086_v60, %v874_v6  ;;  %v1628_v60 = vld [vmem:[%s2517_s10 + $0x18] sm:$0xff] }
 0x226   : > { %v875_v13 = vsub.f32 2.0, %v871_v7 }
 0x228   : > { %v879_v18 = vmul.f32 %v2088_v1, %v875_v13  ;;  %v1876_v1 = vld [vmem:[%s2516_s9] ss:$0 sm:$0xff] }
 0x23f   : > { %v949_v2 = vpop.f32.mrf.mxu0 }
 0x240   : > { %v1172_v3 = vmul.f32 %v949_v2, %v876_v63  ;;  %v1625_v63 = vld [vmem:[%s2517_s10] sm:$0xff] }
 0x241   : > { %v1949_v5 = vpop.f32.mrf.mxu0 }
 0x242   : > { %1968 = vmatmul.mubr.msk.f32.vlgmr.msra.gmra.mxu0 %vm523_vm1, %v1172_v3 }
 0x243   : > { %v1022_v9 = vpop.f32.mrf.mxu1  ;;  %1976 = vmatpush3.msra.mxu0 %v1178_v4  ;;  %1977 = vmatprep.mubr.msk.f32.mxu0 %vm2174_vm0, %v2173_v0 }
 0x244   : > { %v1173_v10 = vmul.f32 %v1022_v9, %v877_v8  ;;  %1985 = vmatprep.subr.mxu0 %v2173_v0 }
 0x245   : > { %v1954_v12 = vpop.f32.mrf.mxu1 }
 0x246   : > { %1973 = vmatmul.mubr.msk.f32.vlgmr.msra.gmra.mxu1 %vm523_vm1, %v1173_v10 }
 0x247   : > { %v1095_v15 = vpop.f32.mrf.mxu0  ;;  %1981 = vmatpush3.msra.mxu1 %v1179_v11  ;;  %1982 = vmatprep.mubr.msk.f32.mxu1 %vm2174_vm0, %v2173_v0 }
 0x248   : > { %v1174_v16 = vmul.f32 %v1095_v15, %v878_v14  ;;  %1996 = vmatprep.subr.mxu1 %v2173_v0 }
 0x249   : > { %v1959_v17 = vpop.f32.mrf.mxu0 }
 0x24a   : > { %1978 = vmatmul.mubr.msk.f32.vlgmr.msra.gmra.mxu0 %vm523_vm1, %v1174_v16 }
 0x24b   : > { %v1168_v19 = vpop.f32.mrf.mxu1  ;;  %1993 = vmatprep.mubr.msk.f32.mxu0 %vm2174_vm0, %v2173_v0  ;;  %1986 = vmatpush3.msra.mxu0 %v1517_v43 }
 0x24c   : > { %v1175_v20 = vmul.f32 %v1168_v19, %v879_v18  ;;  %1987 = vmatprep.subr.mxu0 %v2173_v0 }
 0x24d   : > { %v1964_v21 = vpop.f32.mrf.mxu1  ;;  %1988 = vmatpush3.msra.mxu0 %v1516_v44 }
 0x24e   : > { %1983 = vmatmul.mubr.msk.f32.vlgmr.msra.gmra.mxu1 %vm523_vm1, %v1175_v20  ;;  %1989 = vmatprep.subr.mxu0 %v2173_v0 }
 0x24f   : > { %2012 = vmatprep.mubr.msk.f32.mxu1 %vm2174_vm0, %v2173_v0  ;;  %1990 = vmatpush3.msra.mxu0 %v1515_v45 }
 0x250   : > { %1991 = vmatprep.subr.mxu0 %v2173_v0  ;;  %1997 = vmatpush3.msra.mxu1 %v1632_v56 }
 0x251   : > { %1992 = vmatpush3.msra.mxu0 %v1514_v46  ;;  %1998 = vmatprep.subr.mxu1 %v2173_v0 }
 0x252   : > { %1999 = vmatpush3.msra.mxu1 %v1631_v57 }
 0x253   : > { %2000 = vmatprep.subr.mxu1 %v2173_v0 }
 0x254   : > { %2001 = vmatpush3.msra.mxu1 %v1630_v58 }
 0x255   : > { %2002 = vmatprep.subr.mxu1 %v2173_v0 }
 0x256   : > { %2003 = vmatpush3.msra.mxu1 %v1629_v59 }
 0x257   : > { %2004 = vmatprep.subr.mxu1 %v2173_v0 }
 0x258   : > { %2005 = vmatpush3.msra.mxu1 %v1628_v60 }
 0x259   : > { %2006 = vmatprep.subr.mxu1 %v2173_v0 }
 0x25a   : > { %2007 = vmatpush3.msra.mxu1 %v1627_v61 }
 0x25b   : > { %2008 = vmatprep.subr.mxu1 %v2173_v0 }
 0x25c   : > { %2009 = vmatpush3.msra.mxu1 %v1626_v62 }
 0x25d   : > { %2010 = vmatprep.subr.mxu1 %v2173_v0 }
 0x25e   : > { %2011 = vmatpush3.msra.mxu1 %v1625_v63 }
 0x302   : > { %v1250_v22 = vpop.f32.mrf.mxu0 }
 0x303   : > { %v1260_v27 = vadd.f32 %v1870_v24, %v1250_v22  ;;  %v2175_v24 = vmov -1.0  }
 0x304   : > { %v1969_v23 = vpop.f32.mrf.mxu0 }
 0x306   : > { %v1330_v25 = vpop.f32.mrf.mxu1 }
 0x307   : > { %v1334_v29 = vadd.f32 %v1330_v25, %v1260_v27 }
 0x308   : > { %v1974_v26 = vpop.f32.mrf.mxu1 }
 0x30a   : > { %v1404_v28 = vpop.f32.mrf.mxu0 }
 0x30b   : > { %v1408_v31 = vadd.f32 %v1404_v28, %v1334_v29 }
 0x30c   : > { %v1979_v30 = vpop.f32.mrf.mxu0 }
 0x30d   : > { %v1878_v30 = vld [vmem:[%s2518_s11] ss:$0 sm:$0xff] }
 0x30e   : > { %v1478_v32 = vpop.f32.mrf.mxu1 }
 0x30f   : > { %v1482_v34 = vadd.f32 %v1478_v32, %v1408_v31 }
 0x310   : > { %v1984_v35 = vpop.f32.mrf.mxu1 }
 0x311   : > { %v2401_v36 = vadd.f32 %v1483_v33, %v1482_v34 }
 0x313   : > { %v1486_v37 = vsel %vm1485_vm2, %v2401_v36, 0.0 }
 0x314   : > { %1487 = vadd.xlane.f32.xlu0 %v1486_v37 }
 0x39d   : > { %v1488_v38 = vpop.xlane.xlu0 %1487 }
 0x39e   : > { %v1490_v39 = vmul.f32 0.03125, %v1488_v38 }
 0x3a0   : > { %v1491_v40 = vsub.f32 %v2401_v36, %v1490_v39 }
 0x3a2   : > { %v1492_v41 = vmul.f32 %v1491_v40, %v1491_v40 }
 0x3a4   : > { %v1493_v42 = vsel %vm1485_vm2, %v1492_v41, 0.0 }
 0x3a5   : > { %1494 = vadd.xlane.f32.xlu1 %v1493_v42 }
 0x42e   : > { %v1495_v47 = vpop.xlane.xlu1 %1494 }
 0x42f   : > { %v1496_v48 = vmul.f32 0.03125, %v1495_v47 }
 0x431   : > { %v1497_v49 = vadd.f32 1e-05, %v1496_v48 }
 0x433   : > { %2089 = vrsqrt.f32 %v1497_v49 }
 0x440   : > { %v2090_v50 = vpop.eup %2089 }
 0x441   : > { %v1499_v52 = vmul.f32 %v2090_v50, %v1491_v40 }
 0x443   : > { %v1506_v54 = vmul.f32 %v1874_v51, %v1499_v52 }
 0x445   : > { %v1513_v55 = vadd.f32 %v1875_v53, %v1506_v54 }
 0x447   : > { %1994 = vmatmul.mubr.msk.f32.vlgmr.msra.gmra.mxu0 %vm1485_vm2, %v1513_v55 }
 0x507   : > { %v1594_v2 = vpop.f32.mrf.mxu0 }
 0x508   : > { %v1595_v3 = vadd.f32 %v1876_v1, %v1594_v2 }
 0x509   : > { %v1995_v4 = vpop.f32.mrf.mxu0 }
 0x50a   : > { %v1599_v5 = vmul.f32 0.70710677, %v1595_v3  ;;  %v1598_v27 = vmul.f32 0.5, %v1595_v3 }
 0x50c   : > { %v1602_v6 = vand.u32 2147483647, %v1599_v5  ;;  %vm1600_vm3 = vcmp.ge.f32.partialorder %v1599_v5, 0.0 }
 0x50d   : > { %v1601_v25 = vsel %vm1600_vm3, 1.0, %v2175_v24 }
 0x50e   : > { %v1603_v7 = vmul.f32 0.3275911, %v1602_v6  ;;  %v1616_v9 = vsub.f32 0.0, %v1602_v6 }
 0x510   : > { %v1604_v8 = vadd.f32 1.0, %v1603_v7  ;;  %v1617_v10 = vmul.f32 %v1616_v9, %v1602_v6 }
 0x512   : > { %2091 = vrcp.f32 %v1604_v8  ;;  %v1618_v12 = vmul.f32 1.442695, %v1617_v10 }
 0x514   : > { %2093 = vpow2.f32 %v1618_v12 }
 0x51f   : > { %v2092_v0 = vpop.eup %2091 }
 0x520   : > { %v1607_v11 = vmul.f32 1.0614054, %v2092_v0 }
 0x521   : > { %v2094_v21 = vpop.eup %2093 }
 0x522   : > { %v1608_v13 = vadd.f32 -1.4531521, %v1607_v11 }
 0x524   : > { %v1609_v14 = vmul.f32 %v2092_v0, %v1608_v13 }
 0x526   : > { %v1610_v15 = vadd.f32 1.4214138, %v1609_v14 }
 0x528   : > { %v1611_v16 = vmul.f32 %v2092_v0, %v1610_v15 }
 0x52a   : > { %v1612_v17 = vadd.f32 -0.28449672, %v1611_v16 }
 0x52c   : > { %v1613_v18 = vmul.f32 %v2092_v0, %v1612_v17 }
 0x52e   : > { %v1614_v19 = vadd.f32 0.2548296, %v1613_v18 }
 0x530   : > { %v1615_v20 = vmul.f32 %v2092_v0, %v1614_v19 }
 0x532   : > { %v1620_v22 = vmul.f32 %v2094_v21, %v1615_v20 }
 0x534   : > { %v1621_v23 = vsub.f32 1.0, %v1620_v22 }
 0x536   : > { %v1622_v26 = vmul.f32 %v1621_v23, %v1601_v25 }
 0x538   : > { %v1623_v28 = vadd.f32 1.0, %v1622_v26 }
 0x53a   : > { %v1624_v29 = vmul.f32 %v1623_v28, %v1598_v27 }
 0x53c   : > { %2013 = vmatmul.mubr.msk.f32.vlgmr.msra.gmra.mxu1 %vm1640_vm4, %v1624_v29 }
 0x5fc   : > { %v1710_v31 = vpop.f32.mrf.mxu1 }
 0x5fd   : > { %v1711_v32 = vadd.f32 %v1878_v30, %v1710_v31 }
 0x5fe   : > { %v2014_v33 = vpop.f32.mrf.mxu1 }
 0x5ff   : > { %v1714_v34 = vadd.f32 %v1711_v32, %v2401_v36 }
 0x601   : > { %1715 = vst.msk [vmem:[%s479_s30] sm:$0xff] %vm1485_vm2, %v1714_v34 }
 0x602   : > { %2108 = shalt.err (!%p2105_p5)
}
 0x603   : > { %s2109_s0 = scalar_lea.hbm %s1729_s1, 128  ;;  %s2113_s28 = scalar_lea.hbm %s2519_s12, 256 }
 0x604   : > { %p2110_p6 = scmp.ne.s32.totalorder %s1729_s1, %s2109_s0  ;;  %p2114_p10 = scmp.lt.s32.totalorder %s1729_s1, %s2519_s12 }
 0x605   : > { %p2115_p11 = scmp.lt.s32.totalorder %s2113_s28, %s2109_s0 }
 0x606   : > { %p2111_p7 = pnand %p2110_p6, %p2282_p4 }
 0x607   : > { %p2116_p12 = por %p2115_p11, %p2114_p10 }
 0x608   : > { %p2112_p9 = pneg %p2111_p7 }
 0x60a   : > { %p2117_p13 = pnand %p2116_p12, %p2112_p9 }
 0x60c   : > { %2120 = shalt.err (!%p2117_p13)
}
 0x60d   : > { %2015 = dma.vmem_to_hbm [thread:$0]  (%p2282_p4), %s1732_s14, 128, %s1729_s1, %s1717_s2  }
 0x60e PF: > { %p2021_p0 = scmp.ge.s32.totalorder %s2171_s26, 2  ;;  %s1743_s3 = sand.u32 1, %s2151_s21  }
 0x60f   : > { %s1744_s24 = scalar_lea.sflag [#allocation3], %s1743_s3 }
 0x610   : > { %p2018_p1 = pnand %p2021_p0, %p2289_p8 }
 0x612   : > { %p2019_p2 = pneg %p2018_p1 }
 0x614   : > { %2146 = dma.done.wait (%p2019_p2), %s1744_s24, 128  }
 0x615   : > { %2148 = vsyncadd (%p2019_p2), %s1744_s24, 4294967168  ;;  %s25_s26 = sadd.s32 1, %s2171_s26   ;;  %s2530_s21 = smov %s2155_s22 }
 0x616   : > { %p22_p3 = scmp.ge.s32.totalorder %s25_s26, 4   ;;  %s2531_s22 = smov %s2159_s23 }
 0x617   : > { %s2532_s23 = smov %s2295_s16  ;;  %s2533_s24 = smov %s2167_s25 }
 0x618   : > { %s2534_s25 = smov %s2536_s29  ;;  %24 = sbr.rel (!%p22_p3) target bundleno = 9 (0x9), region = 112 }
 0x61d   :  { %1749 = vsyncpa [#allocation3], 1 }
 0x61e   :  { %1751 = vsyncpa [#allocation3 + $0x1], 1 }

</bundles_post_ra>
